<compile_context>
chip_gen: v6e
topology: v6e:2x2x1
jax: 0.10.0
libtpu: 0.0.40
codegen_flags: <defaults>
</compile_context>

<pallas_src>
import functools

import jax
import jax.numpy as jnp
from jax import lax
from jax.experimental import pallas as pl
from jax.experimental.pallas import tpu as pltpu


def _roberta_emb_kernel(ids_ref, pid_ref,               # SMEM scalar prefetch: flat token ids / position ids
                        pidv_ref, pe_ref, g_ref, b_ref,  # VMEM: pid block, pos(+type) table, LN gamma/beta
                        w_hbm,                           # HBM (pl.ANY): (V, H) word table, gathered by DMA
                        out_ref,                         # (tok, H) output block
                        wbuf, pbuf, sems,                # scratch: word rows (2 halves), pos rows, DMA sems
                        *, tok, pad_id, eps, unroll, vector_pos):
    t = pl.program_id(0)
    nt = pl.num_programs(0)
    h = out_ref.shape[-1]
    zero_row = jnp.zeros((1, h), jnp.float32)            # hoisted (no per-iter broadcast)

    def issue(tile, slot):
        """Start (or zero-fill) the word-row gather for `tile` into buffer half `slot`."""
        base = tile * tok
        dst0 = slot * tok

        @pl.loop(0, tok // unroll)
        def _(j):
            for u in range(unroll):                      # static partial unroll
                i = j * unroll + u
                wid = ids_ref[base + i]

                @pl.when(wid != pad_id)
                def _():
                    pltpu.make_async_copy(
                        w_hbm.at[pl.ds(wid, 1), :],
                        wbuf.at[pl.ds(dst0 + i, 1), :],
                        sems.at[slot]).start()

                @pl.when(wid == pad_id)
                def _():
                    # nn.Embedding(padding_idx=pad_id) keeps this row at zero:
                    # skip the HBM DMA for pad tokens and write zeros directly.
                    wbuf[pl.ds(dst0 + i, 1), :] = zero_row

    def wait(tile, slot):
        """Wait on every row DMA issued by issue(tile, slot), with matching descriptors."""
        base = tile * tok
        dst0 = slot * tok

        @pl.loop(0, tok // unroll)
        def _(j):
            for u in range(unroll):
                i = j * unroll + u
                wid = ids_ref[base + i]

                @pl.when(wid != pad_id)
                def _():
                    pltpu.make_async_copy(
                        w_hbm.at[pl.ds(wid, 1), :],
                        wbuf.at[pl.ds(dst0 + i, 1), :],
                        sems.at[slot]).wait()

    # 1) Prime the pipeline on the first grid step.
    @pl.when(t == 0)
    def _():
        issue(0, 0)

    # 2) Cross-tile prefetch: start tile t+1's gather into the other buffer half
    #    before any wait on tile t (all SMEM scalar reads for t+1 precede waits).
    @pl.when(t + 1 < nt)
    def _():
        issue(t + 1, (t + 1) % 2)

    slot = t % 2

    # 3) Position (+token-type) rows from the small VMEM-resident table.
    if vector_pos:
        pid_vec = pidv_ref[0, 0, :]                                       # (tok,) int32
        pos_rows = jnp.take(pe_ref[...], pid_vec, axis=0, mode="clip")    # (tok, h) f32
    else:
        base = t * tok

        @pl.loop(0, tok // unroll)
        def _(j):
            for u in range(unroll):
                i = j * unroll + u
                p = pid_ref[base + i]
                pbuf[pl.ds(i, 1), :] = pe_ref[pl.ds(p, 1), :]
        pos_rows = pbuf[...]

    # 4) Wait for this tile's word rows (issued during the previous step).
    wait(t, slot)

    row0 = pl.multiple_of(slot * tok, 8)
    wrows = wbuf[pl.ds(row0, tok), :]                                     # (tok, h) f32

    # 5) Sum embeddings + LayerNorm (centered variance, f32 accumulation).
    emb = wrows + pos_rows
    mu = jnp.mean(emb, axis=-1, keepdims=True)
    xc = emb - mu
    var = jnp.mean(xc * xc, axis=-1, keepdims=True)
    inv = lax.rsqrt(var + eps)
    out_ref[...] = (xc * inv * g_ref[...] + b_ref[...]).astype(out_ref.dtype)


def roberta_embeddings(input_ids, word_emb, pos_emb, type_emb, ln_gamma, ln_beta,
                       *, pad_id, eps=1e-5, tok_tile=512, out_dtype=jnp.bfloat16):
    """RoBERTa embeddings forward (word + position + token-type + LayerNorm)."""
    B, S = input_ids.shape
    V, H = word_emb.shape
    P = pos_emb.shape[0]

    # RoBERTa position ids from the padding mask (tiny int32 work; done in XLA).
    ids32 = input_ids.astype(jnp.int32)
    mask = (ids32 != pad_id).astype(jnp.int32)
    pos_ids = jnp.cumsum(mask, axis=1) * mask + pad_id                    # (B, S)

    # Flatten tokens; tile over them (bf16-friendly multiple of 16 rows).
    N = B * S
    tok = max(16, min(tok_tile, N))
    tok = ((tok + 15) // 16) * 16
    Np = ((N + tok - 1) // tok) * tok
    G = Np // tok
    unroll = 8                                            # tok % 16 == 0 -> 8 divides

    ids_flat = jnp.full((Np,), pad_id, jnp.int32).at[:N].set(ids32.reshape(-1))
    pid_flat = jnp.full((Np,), pad_id, jnp.int32).at[:N].set(pos_ids.reshape(-1))
    pid_3d = pid_flat.reshape(G, 1, tok)                  # lane-dense VMEM copy of pids

    # Fold the constant token-type row 0 into the position table (f32, VMEM-resident).
    pos_plus = pos_emb.astype(jnp.float32) + type_emb[0].astype(jnp.float32)
    word_f32 = word_emb.astype(jnp.float32)               # gathered rows stay f32 (see TODO)
    g = ln_gamma.reshape(1, H).astype(jnp.float32)
    b = ln_beta.reshape(1, H).astype(jnp.float32)

    # Explicit VMEM budget: both wbuf halves + pbuf + (double-buffered) pos table
    # + out/pid blocks, with slack; capped for v7x's 64 MiB VMEM.
    out_bytes = jnp.dtype(out_dtype).itemsize
    p_pad = ((P + 7) // 8) * 8
    vmem_needed = (2 * tok * H * 4 + tok * H * 4 + 2 * p_pad * H * 4
                   + 2 * tok * H * out_bytes + 2 * 8 * tok * 4 + 4 * 8 * H * 4)
    vmem_limit = int(min(64 * 1024 * 1024,
                         max(2 * vmem_needed + (2 << 20), 16 * 1024 * 1024)))

    def build(vector_pos):
        kernel = functools.partial(_roberta_emb_kernel, tok=tok, pad_id=pad_id,
                                   eps=eps, unroll=unroll, vector_pos=vector_pos)
        return pl.pallas_call(
            kernel,
            out_shape=jax.ShapeDtypeStruct((Np, H), out_dtype),
            grid_spec=pltpu.PrefetchScalarGridSpec(
                num_scalar_prefetch=2,                    # ids_flat, pid_flat -> SMEM
                grid=(G,),
                in_specs=[
                    pl.BlockSpec((1, 1, tok), lambda t, ids, pid: (t, 0, 0)),  # pid (VMEM block)
                    pl.BlockSpec((P, H), lambda t, ids, pid: (0, 0)),          # pos(+type) table
                    pl.BlockSpec((1, H), lambda t, ids, pid: (0, 0)),          # LN gamma
                    pl.BlockSpec((1, H), lambda t, ids, pid: (0, 0)),          # LN beta
                    pl.BlockSpec(memory_space=pl.ANY),                         # word table in HBM
                ],
                out_specs=pl.BlockSpec((tok, H), lambda t, ids, pid: (t, 0)),
                scratch_shapes=[
                    pltpu.VMEM((2 * tok, H), jnp.float32),  # double-buffered word rows
                    pltpu.VMEM((tok, H), jnp.float32),      # pos rows (fallback path only)
                    pltpu.SemaphoreType.DMA((2,)),          # one shared DMA sem per half
                ]),
            # The cross-step prefetch carries state between grid steps, so the token
            # axis must run sequentially ("arbitrary"); on v7x this forgoes dual-TC
            # sharding of this axis in exchange for hiding the gather latency.
            compiler_params=pltpu.CompilerParams(
                dimension_semantics=("arbitrary",),
                vmem_limit_bytes=vmem_limit),
        )

    args = (ids_flat, pid_flat, pid_3d, pos_plus, g, b, word_f32)
    try:
        out_flat = jax.block_until_ready(build(True)(*args))
    except Exception:
        # jnp.take row gather did not lower on this toolchain: fall back to the
        # unrolled dynamic-slice gather from the VMEM-resident position table.
        out_flat = jax.block_until_ready(build(False)(*args))

    return out_flat[:N].reshape(B, S, H)


def _reference(input_ids, word_emb, pos_emb, type_emb, gamma, beta, pad_id, eps):
    mask = (input_ids != pad_id).astype(jnp.int32)
    pos_ids = jnp.cumsum(mask, axis=1) * mask + pad_id
    emb = (word_emb[input_ids]
           + type_emb[jnp.zeros_like(input_ids)]
           + pos_emb[pos_ids])
    mu = emb.mean(-1, keepdims=True)
    xc = emb - mu
    var = (xc * xc).mean(-1, keepdims=True)
    return xc / jnp.sqrt(var + eps) * gamma + beta


if __name__ == "__main__":
    # Small config consistent with the module.
    B, S = 2, 16
    vocab_size = 64
    hidden_size = 128
    max_position_embeddings = 40
    type_vocab_size = 2
    pad_token_id = 1
    layer_norm_eps = 1e-5

    key = jax.random.PRNGKey(0)
    k_ids, k_w, k_p, k_t, k_g, k_b = jax.random.split(key, 6)

    input_ids = jax.random.randint(k_ids, (B, S), 0, vocab_size, dtype=jnp.int32)
    # Force padding tokens at the end of row 1 (RoBERTa-style padded batch).
    input_ids = input_ids.at[1, S - 4:].set(pad_token_id)

    word_emb = 0.02 * jax.random.normal(k_w, (vocab_size, hidden_size), jnp.float32)
    pos_emb = 0.02 * jax.random.normal(k_p, (max_position_embeddings, hidden_size), jnp.float32)
    type_emb = 0.02 * jax.random.normal(k_t, (type_vocab_size, hidden_size), jnp.float32)
    # nn.Embedding(padding_idx=...) keeps the padding rows at zero.
    word_emb = word_emb.at[pad_token_id].set(0.0)
    pos_emb = pos_emb.at[pad_token_id].set(0.0)

    ln_gamma = 1.0 + 0.1 * jax.random.normal(k_g, (hidden_size,), jnp.float32)
    ln_beta = 0.1 * jax.random.normal(k_b, (hidden_size,), jnp.float32)

    # tok_tile=16 -> two grid steps at this toy size (exercises the double-buffer
    # prefetch, the pad-skip path and the lane-dense bf16 output).
    out = roberta_embeddings(input_ids, word_emb, pos_emb, type_emb,
                             ln_gamma, ln_beta,
                             pad_id=pad_token_id, eps=layer_norm_eps,
                             tok_tile=16, out_dtype=jnp.bfloat16)
    out = jax.block_until_ready(out)

    ref = _reference(input_ids, word_emb, pos_emb, type_emb,
                     ln_gamma, ln_beta, pad_token_id, layer_norm_eps)

    assert out.shape == (B, S, hidden_size)
    err = float(jnp.max(jnp.abs(out.astype(jnp.float32) - ref)))
    assert err < 3e-2, f"max abs err {err}"
    print("KERNEL_OK")
</pallas_src>

<mosaic_0001>
module attributes {stable_mosaic.version = 11 : i64} {
  func.func @_roberta_emb_kernel(%arg0: i32, %arg1: memref<32xi32, #tpu.memory_space<smem>>, %arg2: memref<32xi32, #tpu.memory_space<smem>>, %arg3: memref<1x1x16xi32, #tpu.memory_space<vmem>>, %arg4: memref<40x128xf32, #tpu.memory_space<vmem>>, %arg5: memref<1x128xf32, #tpu.memory_space<vmem>>, %arg6: memref<1x128xf32, #tpu.memory_space<vmem>>, %arg7: memref<64x128xf32, #tpu.memory_space<any>>, %arg8: memref<16x128xbf16, #tpu.memory_space<vmem>>, %arg9: memref<32x128xf32, #tpu.memory_space<vmem>>, %arg10: memref<16x128xf32, #tpu.memory_space<vmem>>, %arg11: memref<2x!tpu.dma_semaphore, #tpu.memory_space<semaphore_mem>>) attributes {dimension_semantics = [#tpu.dimension_semantics<arbitrary>], iteration_bounds = array<i64: 2>, scalar_prefetch = 2 : i64, scratch_operands = 3 : i64, tpu.core_type = #tpu.core_type<tc>, window_params = [{transform_indices = @transform_0, window_bounds = array<i64: 1, 1, 16>}, {pipeline_mode = #tpu.pipeline_mode<synchronous>, transform_indices = @transform_1, window_bounds = array<i64: 40, 128>}, {pipeline_mode = #tpu.pipeline_mode<synchronous>, transform_indices = @transform_2, window_bounds = array<i64: 1, 128>}, {pipeline_mode = #tpu.pipeline_mode<synchronous>, transform_indices = @transform_3, window_bounds = array<i64: 1, 128>}, {}, {transform_indices = @transform_5, window_bounds = array<i64: 16, 128>}]} {
    %cst = arith.constant 0.000000e+00 : f32
    %0 = vector.broadcast %cst : f32 to vector<1x128xf32>
    %c0_i32 = arith.constant 0 : i32
    %1 = arith.cmpi eq, %arg0, %c0_i32 : i32
    %2 = arith.extui %1 : i1 to i32
    %c0_i32_0 = arith.constant 0 : i32
    %3 = arith.cmpi ne, %2, %c0_i32_0 : i32
    scf.if %3 {
      %c0_i32_32 = arith.constant 0 : i32
      %c2_i32_33 = arith.constant 2 : i32
      %53 = arith.addi %c0_i32_32, %c2_i32_33 : i32
      %c1_i32_34 = arith.constant 1 : i32
      scf.for %arg12 = %c0_i32_32 to %53 step %c1_i32_34  : i32 {
        %c1_i32_36 = arith.constant 1 : i32
        %54 = arith.muli %arg12, %c1_i32_36 : i32
        %c0_i32_37 = arith.constant 0 : i32
        %55 = arith.addi %c0_i32_37, %54 : i32
        %c8_i32 = arith.constant 8 : i32
        %56 = arith.muli %55, %c8_i32 : i32
        %c0_i32_38 = arith.constant 0 : i32
        %57 = arith.addi %56, %c0_i32_38 : i32
        %c0_i32_39 = arith.constant 0 : i32
        %58 = arith.addi %c0_i32_39, %57 : i32
        %59 = arith.index_cast %58 : i32 to index
        %60 = memref.load %arg1[%59] : memref<32xi32, #tpu.memory_space<smem>>
        %c1_i32_40 = arith.constant 1 : i32
        %61 = arith.cmpi ne, %60, %c1_i32_40 : i32
        %62 = arith.extui %61 : i1 to i32
        %c0_i32_41 = arith.constant 0 : i32
        %63 = arith.cmpi ne, %62, %c0_i32_41 : i32
        scf.if %63 {
          %c0_i32_88 = arith.constant 0 : i32
          %144 = arith.addi %c0_i32_88, %57 : i32
          %c0_i32_89 = arith.constant 0 : i32
          %c0_i32_90 = arith.constant 0 : i32
          %145 = tpu.memref_slice %arg7[%60, %c0_i32_90] : memref<64x128xf32, #tpu.memory_space<any>> -> memref<1x128xf32, #tpu.memory_space<any>>
          %c0_i32_91 = arith.constant 0 : i32
          %146 = tpu.memref_slice %arg9[%144, %c0_i32_91] : memref<32x128xf32, #tpu.memory_space<vmem>> -> memref<1x128xf32, #tpu.memory_space<vmem>>
          %147 = tpu.memref_slice %arg11[%c0_i32_89] : memref<2x!tpu.dma_semaphore, #tpu.memory_space<semaphore_mem>> -> memref<1x!tpu.dma_semaphore, #tpu.memory_space<semaphore_mem>>
          %148 = tpu.memref_squeeze %147 : memref<1x!tpu.dma_semaphore, #tpu.memory_space<semaphore_mem>> -> memref<!tpu.dma_semaphore, #tpu.memory_space<semaphore_mem>>
          tpu.enqueue_dma source(%145 : memref<1x128xf32, #tpu.memory_space<any>>) target(%146 : memref<1x128xf32, #tpu.memory_space<vmem>>) target_semaphore(%148 : memref<!tpu.dma_semaphore, #tpu.memory_space<semaphore_mem>>)
        } else {
        }
        %c1_i32_42 = arith.constant 1 : i32
        %64 = arith.cmpi eq, %60, %c1_i32_42 : i32
        %65 = arith.extui %64 : i1 to i32
        %c0_i32_43 = arith.constant 0 : i32
        %66 = arith.cmpi ne, %65, %c0_i32_43 : i32
        scf.if %66 {
          %c0_i32_88 = arith.constant 0 : i32
          %144 = arith.addi %c0_i32_88, %57 : i32
          %145 = arith.index_cast %144 : i32 to index
          %c0_89 = arith.constant 0 : index
          %146 = vector.load %arg9[%145, %c0_89] : memref<32x128xf32, #tpu.memory_space<vmem>>, vector<1x128xf32>
          tpu.vector_store %arg9[%145, %c0_89], %0 {strides = array<i32>} : memref<32x128xf32, #tpu.memory_space<vmem>>, vector<1x128xf32>,
        } else {
        }
        %c8_i32_44 = arith.constant 8 : i32
        %67 = arith.muli %55, %c8_i32_44 : i32
        %c1_i32_45 = arith.constant 1 : i32
        %68 = arith.addi %67, %c1_i32_45 : i32
        %c0_i32_46 = arith.constant 0 : i32
        %69 = arith.addi %c0_i32_46, %68 : i32
        %70 = arith.index_cast %69 : i32 to index
        %71 = memref.load %arg1[%70] : memref<32xi32, #tpu.memory_space<smem>>
        %c1_i32_47 = arith.constant 1 : i32
        %72 = arith.cmpi ne, %71, %c1_i32_47 : i32
        %73 = arith.extui %72 : i1 to i32
        %c0_i32_48 = arith.constant 0 : i32
        %74 = arith.cmpi ne, %73, %c0_i32_48 : i32
        scf.if %74 {
          %c0_i32_88 = arith.constant 0 : i32
          %144 = arith.addi %c0_i32_88, %68 : i32
          %c0_i32_89 = arith.constant 0 : i32
          %c0_i32_90 = arith.constant 0 : i32
          %145 = tpu.memref_slice %arg7[%71, %c0_i32_90] : memref<64x128xf32, #tpu.memory_space<any>> -> memref<1x128xf32, #tpu.memory_space<any>>
          %c0_i32_91 = arith.constant 0 : i32
          %146 = tpu.memref_slice %arg9[%144, %c0_i32_91] : memref<32x128xf32, #tpu.memory_space<vmem>> -> memref<1x128xf32, #tpu.memory_space<vmem>>
          %147 = tpu.memref_slice %arg11[%c0_i32_89] : memref<2x!tpu.dma_semaphore, #tpu.memory_space<semaphore_mem>> -> memref<1x!tpu.dma_semaphore, #tpu.memory_space<semaphore_mem>>
          %148 = tpu.memref_squeeze %147 : memref<1x!tpu.dma_semaphore, #tpu.memory_space<semaphore_mem>> -> memref<!tpu.dma_semaphore, #tpu.memory_space<semaphore_mem>>
          tpu.enqueue_dma source(%145 : memref<1x128xf32, #tpu.memory_space<any>>) target(%146 : memref<1x128xf32, #tpu.memory_space<vmem>>) target_semaphore(%148 : memref<!tpu.dma_semaphore, #tpu.memory_space<semaphore_mem>>)
        } else {
        }
        %c1_i32_49 = arith.constant 1 : i32
        %75 = arith.cmpi eq, %71, %c1_i32_49 : i32
        %76 = arith.extui %75 : i1 to i32
        %c0_i32_50 = arith.constant 0 : i32
        %77 = arith.cmpi ne, %76, %c0_i32_50 : i32
        scf.if %77 {
          %c0_i32_88 = arith.constant 0 : i32
          %144 = arith.addi %c0_i32_88, %68 : i32
          %145 = arith.index_cast %144 : i32 to index
          %c0_89 = arith.constant 0 : index
          %146 = vector.load %arg9[%145, %c0_89] : memref<32x128xf32, #tpu.memory_space<vmem>>, vector<1x128xf32>
          tpu.vector_store %arg9[%145, %c0_89], %0 {strides = array<i32>} : memref<32x128xf32, #tpu.memory_space<vmem>>, vector<1x128xf32>,
        } else {
        }
        %c8_i32_51 = arith.constant 8 : i32
        %78 = arith.muli %55, %c8_i32_51 : i32
        %c2_i32_52 = arith.constant 2 : i32
        %79 = arith.addi %78, %c2_i32_52 : i32
        %c0_i32_53 = arith.constant 0 : i32
        %80 = arith.addi %c0_i32_53, %79 : i32
        %81 = arith.index_cast %80 : i32 to index
        %82 = memref.load %arg1[%81] : memref<32xi32, #tpu.memory_space<smem>>
        %c1_i32_54 = arith.constant 1 : i32
        %83 = arith.cmpi ne, %82, %c1_i32_54 : i32
        %84 = arith.extui %83 : i1 to i32
        %c0_i32_55 = arith.constant 0 : i32
        %85 = arith.cmpi ne, %84, %c0_i32_55 : i32
        scf.if %85 {
          %c0_i32_88 = arith.constant 0 : i32
          %144 = arith.addi %c0_i32_88, %79 : i32
          %c0_i32_89 = arith.constant 0 : i32
          %c0_i32_90 = arith.constant 0 : i32
          %145 = tpu.memref_slice %arg7[%82, %c0_i32_90] : memref<64x128xf32, #tpu.memory_space<any>> -> memref<1x128xf32, #tpu.memory_space<any>>
          %c0_i32_91 = arith.constant 0 : i32
          %146 = tpu.memref_slice %arg9[%144, %c0_i32_91] : memref<32x128xf32, #tpu.memory_space<vmem>> -> memref<1x128xf32, #tpu.memory_space<vmem>>
          %147 = tpu.memref_slice %arg11[%c0_i32_89] : memref<2x!tpu.dma_semaphore, #tpu.memory_space<semaphore_mem>> -> memref<1x!tpu.dma_semaphore, #tpu.memory_space<semaphore_mem>>
          %148 = tpu.memref_squeeze %147 : memref<1x!tpu.dma_semaphore, #tpu.memory_space<semaphore_mem>> -> memref<!tpu.dma_semaphore, #tpu.memory_space<semaphore_mem>>
          tpu.enqueue_dma source(%145 : memref<1x128xf32, #tpu.memory_space<any>>) target(%146 : memref<1x128xf32, #tpu.memory_space<vmem>>) target_semaphore(%148 : memref<!tpu.dma_semaphore, #tpu.memory_space<semaphore_mem>>)
        } else {
        }
        %c1_i32_56 = arith.constant 1 : i32
        %86 = arith.cmpi eq, %82, %c1_i32_56 : i32
        %87 = arith.extui %86 : i1 to i32
        %c0_i32_57 = arith.constant 0 : i32
        %88 = arith.cmpi ne, %87, %c0_i32_57 : i32
        scf.if %88 {
          %c0_i32_88 = arith.constant 0 : i32
          %144 = arith.addi %c0_i32_88, %79 : i32
          %145 = arith.index_cast %144 : i32 to index
          %c0_89 = arith.constant 0 : index
          %146 = vector.load %arg9[%145, %c0_89] : memref<32x128xf32, #tpu.memory_space<vmem>>, vector<1x128xf32>
          tpu.vector_store %arg9[%145, %c0_89], %0 {strides = array<i32>} : memref<32x128xf32, #tpu.memory_space<vmem>>, vector<1x128xf32>,
        } else {
        }
        %c8_i32_58 = arith.constant 8 : i32
        %89 = arith.muli %55, %c8_i32_58 : i32
        %c3_i32 = arith.constant 3 : i32
        %90 = arith.addi %89, %c3_i32 : i32
        %c0_i32_59 = arith.constant 0 : i32
        %91 = arith.addi %c0_i32_59, %90 : i32
        %92 = arith.index_cast %91 : i32 to index
        %93 = memref.load %arg1[%92] : memref<32xi32, #tpu.memory_space<smem>>
        %c1_i32_60 = arith.constant 1 : i32
        %94 = arith.cmpi ne, %93, %c1_i32_60 : i32
        %95 = arith.extui %94 : i1 to i32
        %c0_i32_61 = arith.constant 0 : i32
        %96 = arith.cmpi ne, %95, %c0_i32_61 : i32
        scf.if %96 {
          %c0_i32_88 = arith.constant 0 : i32
          %144 = arith.addi %c0_i32_88, %90 : i32
          %c0_i32_89 = arith.constant 0 : i32
          %c0_i32_90 = arith.constant 0 : i32
          %145 = tpu.memref_slice %arg7[%93, %c0_i32_90] : memref<64x128xf32, #tpu.memory_space<any>> -> memref<1x128xf32, #tpu.memory_space<any>>
          %c0_i32_91 = arith.constant 0 : i32
          %146 = tpu.memref_slice %arg9[%144, %c0_i32_91] : memref<32x128xf32, #tpu.memory_space<vmem>> -> memref<1x128xf32, #tpu.memory_space<vmem>>
          %147 = tpu.memref_slice %arg11[%c0_i32_89] : memref<2x!tpu.dma_semaphore, #tpu.memory_space<semaphore_mem>> -> memref<1x!tpu.dma_semaphore, #tpu.memory_space<semaphore_mem>>
          %148 = tpu.memref_squeeze %147 : memref<1x!tpu.dma_semaphore, #tpu.memory_space<semaphore_mem>> -> memref<!tpu.dma_semaphore, #tpu.memory_space<semaphore_mem>>
          tpu.enqueue_dma source(%145 : memref<1x128xf32, #tpu.memory_space<any>>) target(%146 : memref<1x128xf32, #tpu.memory_space<vmem>>) target_semaphore(%148 : memref<!tpu.dma_semaphore, #tpu.memory_space<semaphore_mem>>)
        } else {
        }
        %c1_i32_62 = arith.constant 1 : i32
        %97 = arith.cmpi eq, %93, %c1_i32_62 : i32
        %98 = arith.extui %97 : i1 to i32
        %c0_i32_63 = arith.constant 0 : i32
        %99 = arith.cmpi ne, %98, %c0_i32_63 : i32
        scf.if %99 {
          %c0_i32_88 = arith.constant 0 : i32
          %144 = arith.addi %c0_i32_88, %90 : i32
          %145 = arith.index_cast %144 : i32 to index
          %c0_89 = arith.constant 0 : index
          %146 = vector.load %arg9[%145, %c0_89] : memref<32x128xf32, #tpu.memory_space<vmem>>, vector<1x128xf32>
          tpu.vector_store %arg9[%145, %c0_89], %0 {strides = array<i32>} : memref<32x128xf32, #tpu.memory_space<vmem>>, vector<1x128xf32>,
        } else {
        }
        %c8_i32_64 = arith.constant 8 : i32
        %100 = arith.muli %55, %c8_i32_64 : i32
        %c4_i32 = arith.constant 4 : i32
        %101 = arith.addi %100, %c4_i32 : i32
        %c0_i32_65 = arith.constant 0 : i32
        %102 = arith.addi %c0_i32_65, %101 : i32
        %103 = arith.index_cast %102 : i32 to index
        %104 = memref.load %arg1[%103] : memref<32xi32, #tpu.memory_space<smem>>
        %c1_i32_66 = arith.constant 1 : i32
        %105 = arith.cmpi ne, %104, %c1_i32_66 : i32
        %106 = arith.extui %105 : i1 to i32
        %c0_i32_67 = arith.constant 0 : i32
        %107 = arith.cmpi ne, %106, %c0_i32_67 : i32
        scf.if %107 {
          %c0_i32_88 = arith.constant 0 : i32
          %144 = arith.addi %c0_i32_88, %101 : i32
          %c0_i32_89 = arith.constant 0 : i32
          %c0_i32_90 = arith.constant 0 : i32
          %145 = tpu.memref_slice %arg7[%104, %c0_i32_90] : memref<64x128xf32, #tpu.memory_space<any>> -> memref<1x128xf32, #tpu.memory_space<any>>
          %c0_i32_91 = arith.constant 0 : i32
          %146 = tpu.memref_slice %arg9[%144, %c0_i32_91] : memref<32x128xf32, #tpu.memory_space<vmem>> -> memref<1x128xf32, #tpu.memory_space<vmem>>
          %147 = tpu.memref_slice %arg11[%c0_i32_89] : memref<2x!tpu.dma_semaphore, #tpu.memory_space<semaphore_mem>> -> memref<1x!tpu.dma_semaphore, #tpu.memory_space<semaphore_mem>>
          %148 = tpu.memref_squeeze %147 : memref<1x!tpu.dma_semaphore, #tpu.memory_space<semaphore_mem>> -> memref<!tpu.dma_semaphore, #tpu.memory_space<semaphore_mem>>
          tpu.enqueue_dma source(%145 : memref<1x128xf32, #tpu.memory_space<any>>) target(%146 : memref<1x128xf32, #tpu.memory_space<vmem>>) target_semaphore(%148 : memref<!tpu.dma_semaphore, #tpu.memory_space<semaphore_mem>>)
        } else {
        }
        %c1_i32_68 = arith.constant 1 : i32
        %108 = arith.cmpi eq, %104, %c1_i32_68 : i32
        %109 = arith.extui %108 : i1 to i32
        %c0_i32_69 = arith.constant 0 : i32
        %110 = arith.cmpi ne, %109, %c0_i32_69 : i32
        scf.if %110 {
          %c0_i32_88 = arith.constant 0 : i32
          %144 = arith.addi %c0_i32_88, %101 : i32
          %145 = arith.index_cast %144 : i32 to index
          %c0_89 = arith.constant 0 : index
          %146 = vector.load %arg9[%145, %c0_89] : memref<32x128xf32, #tpu.memory_space<vmem>>, vector<1x128xf32>
          tpu.vector_store %arg9[%145, %c0_89], %0 {strides = array<i32>} : memref<32x128xf32, #tpu.memory_space<vmem>>, vector<1x128xf32>,
        } else {
        }
        %c8_i32_70 = arith.constant 8 : i32
        %111 = arith.muli %55, %c8_i32_70 : i32
        %c5_i32 = arith.constant 5 : i32
        %112 = arith.addi %111, %c5_i32 : i32
        %c0_i32_71 = arith.constant 0 : i32
        %113 = arith.addi %c0_i32_71, %112 : i32
        %114 = arith.index_cast %113 : i32 to index
        %115 = memref.load %arg1[%114] : memref<32xi32, #tpu.memory_space<smem>>
        %c1_i32_72 = arith.constant 1 : i32
        %116 = arith.cmpi ne, %115, %c1_i32_72 : i32
        %117 = arith.extui %116 : i1 to i32
        %c0_i32_73 = arith.constant 0 : i32
        %118 = arith.cmpi ne, %117, %c0_i32_73 : i32
        scf.if %118 {
          %c0_i32_88 = arith.constant 0 : i32
          %144 = arith.addi %c0_i32_88, %112 : i32
          %c0_i32_89 = arith.constant 0 : i32
          %c0_i32_90 = arith.constant 0 : i32
          %145 = tpu.memref_slice %arg7[%115, %c0_i32_90] : memref<64x128xf32, #tpu.memory_space<any>> -> memref<1x128xf32, #tpu.memory_space<any>>
          %c0_i32_91 = arith.constant 0 : i32
          %146 = tpu.memref_slice %arg9[%144, %c0_i32_91] : memref<32x128xf32, #tpu.memory_space<vmem>> -> memref<1x128xf32, #tpu.memory_space<vmem>>
          %147 = tpu.memref_slice %arg11[%c0_i32_89] : memref<2x!tpu.dma_semaphore, #tpu.memory_space<semaphore_mem>> -> memref<1x!tpu.dma_semaphore, #tpu.memory_space<semaphore_mem>>
          %148 = tpu.memref_squeeze %147 : memref<1x!tpu.dma_semaphore, #tpu.memory_space<semaphore_mem>> -> memref<!tpu.dma_semaphore, #tpu.memory_space<semaphore_mem>>
          tpu.enqueue_dma source(%145 : memref<1x128xf32, #tpu.memory_space<any>>) target(%146 : memref<1x128xf32, #tpu.memory_space<vmem>>) target_semaphore(%148 : memref<!tpu.dma_semaphore, #tpu.memory_space<semaphore_mem>>)
        } else {
        }
        %c1_i32_74 = arith.constant 1 : i32
        %119 = arith.cmpi eq, %115, %c1_i32_74 : i32
        %120 = arith.extui %119 : i1 to i32
        %c0_i32_75 = arith.constant 0 : i32
        %121 = arith.cmpi ne, %120, %c0_i32_75 : i32
        scf.if %121 {
          %c0_i32_88 = arith.constant 0 : i32
          %144 = arith.addi %c0_i32_88, %112 : i32
          %145 = arith.index_cast %144 : i32 to index
          %c0_89 = arith.constant 0 : index
          %146 = vector.load %arg9[%145, %c0_89] : memref<32x128xf32, #tpu.memory_space<vmem>>, vector<1x128xf32>
          tpu.vector_store %arg9[%145, %c0_89], %0 {strides = array<i32>} : memref<32x128xf32, #tpu.memory_space<vmem>>, vector<1x128xf32>,
        } else {
        }
        %c8_i32_76 = arith.constant 8 : i32
        %122 = arith.muli %55, %c8_i32_76 : i32
        %c6_i32 = arith.constant 6 : i32
        %123 = arith.addi %122, %c6_i32 : i32
        %c0_i32_77 = arith.constant 0 : i32
        %124 = arith.addi %c0_i32_77, %123 : i32
        %125 = arith.index_cast %124 : i32 to index
        %126 = memref.load %arg1[%125] : memref<32xi32, #tpu.memory_space<smem>>
        %c1_i32_78 = arith.constant 1 : i32
        %127 = arith.cmpi ne, %126, %c1_i32_78 : i32
        %128 = arith.extui %127 : i1 to i32
        %c0_i32_79 = arith.constant 0 : i32
        %129 = arith.cmpi ne, %128, %c0_i32_79 : i32
        scf.if %129 {
          %c0_i32_88 = arith.constant 0 : i32
          %144 = arith.addi %c0_i32_88, %123 : i32
          %c0_i32_89 = arith.constant 0 : i32
          %c0_i32_90 = arith.constant 0 : i32
          %145 = tpu.memref_slice %arg7[%126, %c0_i32_90] : memref<64x128xf32, #tpu.memory_space<any>> -> memref<1x128xf32, #tpu.memory_space<any>>
          %c0_i32_91 = arith.constant 0 : i32
          %146 = tpu.memref_slice %arg9[%144, %c0_i32_91] : memref<32x128xf32, #tpu.memory_space<vmem>> -> memref<1x128xf32, #tpu.memory_space<vmem>>
          %147 = tpu.memref_slice %arg11[%c0_i32_89] : memref<2x!tpu.dma_semaphore, #tpu.memory_space<semaphore_mem>> -> memref<1x!tpu.dma_semaphore, #tpu.memory_space<semaphore_mem>>
          %148 = tpu.memref_squeeze %147 : memref<1x!tpu.dma_semaphore, #tpu.memory_space<semaphore_mem>> -> memref<!tpu.dma_semaphore, #tpu.memory_space<semaphore_mem>>
          tpu.enqueue_dma source(%145 : memref<1x128xf32, #tpu.memory_space<any>>) target(%146 : memref<1x128xf32, #tpu.memory_space<vmem>>) target_semaphore(%148 : memref<!tpu.dma_semaphore, #tpu.memory_space<semaphore_mem>>)
        } else {
        }
        %c1_i32_80 = arith.constant 1 : i32
        %130 = arith.cmpi eq, %126, %c1_i32_80 : i32
        %131 = arith.extui %130 : i1 to i32
        %c0_i32_81 = arith.constant 0 : i32
        %132 = arith.cmpi ne, %131, %c0_i32_81 : i32
        scf.if %132 {
          %c0_i32_88 = arith.constant 0 : i32
          %144 = arith.addi %c0_i32_88, %123 : i32
          %145 = arith.index_cast %144 : i32 to index
          %c0_89 = arith.constant 0 : index
          %146 = vector.load %arg9[%145, %c0_89] : memref<32x128xf32, #tpu.memory_space<vmem>>, vector<1x128xf32>
          tpu.vector_store %arg9[%145, %c0_89], %0 {strides = array<i32>} : memref<32x128xf32, #tpu.memory_space<vmem>>, vector<1x128xf32>,
        } else {
        }
        %c8_i32_82 = arith.constant 8 : i32
        %133 = arith.muli %55, %c8_i32_82 : i32
        %c7_i32 = arith.constant 7 : i32
        %134 = arith.addi %133, %c7_i32 : i32
        %c0_i32_83 = arith.constant 0 : i32
        %135 = arith.addi %c0_i32_83, %134 : i32
        %136 = arith.index_cast %135 : i32 to index
        %137 = memref.load %arg1[%136] : memref<32xi32, #tpu.memory_space<smem>>
        %c1_i32_84 = arith.constant 1 : i32
        %138 = arith.cmpi ne, %137, %c1_i32_84 : i32
        %139 = arith.extui %138 : i1 to i32
        %c0_i32_85 = arith.constant 0 : i32
        %140 = arith.cmpi ne, %139, %c0_i32_85 : i32
        scf.if %140 {
          %c0_i32_88 = arith.constant 0 : i32
          %144 = arith.addi %c0_i32_88, %134 : i32
          %c0_i32_89 = arith.constant 0 : i32
          %c0_i32_90 = arith.constant 0 : i32
          %145 = tpu.memref_slice %arg7[%137, %c0_i32_90] : memref<64x128xf32, #tpu.memory_space<any>> -> memref<1x128xf32, #tpu.memory_space<any>>
          %c0_i32_91 = arith.constant 0 : i32
          %146 = tpu.memref_slice %arg9[%144, %c0_i32_91] : memref<32x128xf32, #tpu.memory_space<vmem>> -> memref<1x128xf32, #tpu.memory_space<vmem>>
          %147 = tpu.memref_slice %arg11[%c0_i32_89] : memref<2x!tpu.dma_semaphore, #tpu.memory_space<semaphore_mem>> -> memref<1x!tpu.dma_semaphore, #tpu.memory_space<semaphore_mem>>
          %148 = tpu.memref_squeeze %147 : memref<1x!tpu.dma_semaphore, #tpu.memory_space<semaphore_mem>> -> memref<!tpu.dma_semaphore, #tpu.memory_space<semaphore_mem>>
          tpu.enqueue_dma source(%145 : memref<1x128xf32, #tpu.memory_space<any>>) target(%146 : memref<1x128xf32, #tpu.memory_space<vmem>>) target_semaphore(%148 : memref<!tpu.dma_semaphore, #tpu.memory_space<semaphore_mem>>)
        } else {
        }
        %c1_i32_86 = arith.constant 1 : i32
        %141 = arith.cmpi eq, %137, %c1_i32_86 : i32
        %142 = arith.extui %141 : i1 to i32
        %c0_i32_87 = arith.constant 0 : i32
        %143 = arith.cmpi ne, %142, %c0_i32_87 : i32
        scf.if %143 {
          %c0_i32_88 = arith.constant 0 : i32
          %144 = arith.addi %c0_i32_88, %134 : i32
          %145 = arith.index_cast %144 : i32 to index
          %c0_89 = arith.constant 0 : index
          %146 = vector.load %arg9[%145, %c0_89] : memref<32x128xf32, #tpu.memory_space<vmem>>, vector<1x128xf32>
          tpu.vector_store %arg9[%145, %c0_89], %0 {strides = array<i32>} : memref<32x128xf32, #tpu.memory_space<vmem>>, vector<1x128xf32>,
        } else {
        }
      }
      %c2_i32_35 = arith.constant 2 : i32
    } else {
    }
    %c1_i32 = arith.constant 1 : i32
    %4 = arith.addi %arg0, %c1_i32 : i32
    %c2_i32 = arith.constant 2 : i32
    %5 = arith.cmpi slt, %4, %c2_i32 : i32
    %6 = arith.extui %5 : i1 to i32
    %c0_i32_1 = arith.constant 0 : i32
    %7 = arith.cmpi ne, %6, %c0_i32_1 : i32
    scf.if %7 {
      %c1_i32_32 = arith.constant 1 : i32
      %53 = arith.addi %arg0, %c1_i32_32 : i32
      %c1_i32_33 = arith.constant 1 : i32
      %54 = arith.addi %arg0, %c1_i32_33 : i32
      %c2_i32_34 = arith.constant 2 : i32
      %c0_i32_35 = arith.constant 0 : i32
      %55 = arith.cmpi eq, %c2_i32_34, %c0_i32_35 : i32
      %c1_i32_36 = arith.constant 1 : i32
      %56 = arith.select %55, %c1_i32_36, %c2_i32_34 : i32
      %57 = arith.remsi %54, %56 : i32
      %c0_i32_37 = arith.constant 0 : i32
      %58 = arith.cmpi ne, %57, %c0_i32_37 : i32
      %c0_i32_38 = arith.constant 0 : i32
      %59 = arith.cmpi slt, %57, %c0_i32_38 : i32
      %c0_i32_39 = arith.constant 0 : i32
      %60 = arith.cmpi slt, %56, %c0_i32_39 : i32
      %61 = arith.xori %59, %60 : i1
      %62 = arith.andi %61, %58 : i1
      %63 = arith.addi %57, %56 : i32
      %64 = arith.select %62, %63, %57 : i32
      %c16_i32_40 = arith.constant 16 : i32
      %65 = arith.muli %53, %c16_i32_40 : i32
      %c16_i32_41 = arith.constant 16 : i32
      %66 = arith.muli %64, %c16_i32_41 : i32
      %c0_i32_42 = arith.constant 0 : i32
      %c2_i32_43 = arith.constant 2 : i32
      %67 = arith.addi %c0_i32_42, %c2_i32_43 : i32
      %c1_i32_44 = arith.constant 1 : i32
      scf.for %arg12 = %c0_i32_42 to %67 step %c1_i32_44  : i32 {
        %c1_i32_46 = arith.constant 1 : i32
        %68 = arith.muli %arg12, %c1_i32_46 : i32
        %c0_i32_47 = arith.constant 0 : i32
        %69 = arith.addi %c0_i32_47, %68 : i32
        %c8_i32 = arith.constant 8 : i32
        %70 = arith.muli %69, %c8_i32 : i32
        %c0_i32_48 = arith.constant 0 : i32
        %71 = arith.addi %70, %c0_i32_48 : i32
        %72 = arith.addi %65, %71 : i32
        %73 = arith.index_cast %72 : i32 to index
        %74 = memref.load %arg1[%73] : memref<32xi32, #tpu.memory_space<smem>>
        %c1_i32_49 = arith.constant 1 : i32
        %75 = arith.cmpi ne, %74, %c1_i32_49 : i32
        %76 = arith.extui %75 : i1 to i32
        %c0_i32_50 = arith.constant 0 : i32
        %77 = arith.cmpi ne, %76, %c0_i32_50 : i32
        scf.if %77 {
          %158 = arith.addi %66, %71 : i32
          %c0_i32_90 = arith.constant 0 : i32
          %159 = tpu.memref_slice %arg7[%74, %c0_i32_90] : memref<64x128xf32, #tpu.memory_space<any>> -> memref<1x128xf32, #tpu.memory_space<any>>
          %c0_i32_91 = arith.constant 0 : i32
          %160 = tpu.memref_slice %arg9[%158, %c0_i32_91] : memref<32x128xf32, #tpu.memory_space<vmem>> -> memref<1x128xf32, #tpu.memory_space<vmem>>
          %161 = tpu.memref_slice %arg11[%64] : memref<2x!tpu.dma_semaphore, #tpu.memory_space<semaphore_mem>> -> memref<1x!tpu.dma_semaphore, #tpu.memory_space<semaphore_mem>>
          %162 = tpu.memref_squeeze %161 : memref<1x!tpu.dma_semaphore, #tpu.memory_space<semaphore_mem>> -> memref<!tpu.dma_semaphore, #tpu.memory_space<semaphore_mem>>
          tpu.enqueue_dma source(%159 : memref<1x128xf32, #tpu.memory_space<any>>) target(%160 : memref<1x128xf32, #tpu.memory_space<vmem>>) target_semaphore(%162 : memref<!tpu.dma_semaphore, #tpu.memory_space<semaphore_mem>>)
        } else {
        }
        %c1_i32_51 = arith.constant 1 : i32
        %78 = arith.cmpi eq, %74, %c1_i32_51 : i32
        %79 = arith.extui %78 : i1 to i32
        %c0_i32_52 = arith.constant 0 : i32
        %80 = arith.cmpi ne, %79, %c0_i32_52 : i32
        scf.if %80 {
          %158 = arith.addi %66, %71 : i32
          %159 = arith.index_cast %158 : i32 to index
          %c0_90 = arith.constant 0 : index
          %160 = vector.load %arg9[%159, %c0_90] : memref<32x128xf32, #tpu.memory_space<vmem>>, vector<1x128xf32>
          tpu.vector_store %arg9[%159, %c0_90], %0 {strides = array<i32>} : memref<32x128xf32, #tpu.memory_space<vmem>>, vector<1x128xf32>,
        } else {
        }
        %c8_i32_53 = arith.constant 8 : i32
        %81 = arith.muli %69, %c8_i32_53 : i32
        %c1_i32_54 = arith.constant 1 : i32
        %82 = arith.addi %81, %c1_i32_54 : i32
        %83 = arith.addi %65, %82 : i32
        %84 = arith.index_cast %83 : i32 to index
        %85 = memref.load %arg1[%84] : memref<32xi32, #tpu.memory_space<smem>>
        %c1_i32_55 = arith.constant 1 : i32
        %86 = arith.cmpi ne, %85, %c1_i32_55 : i32
        %87 = arith.extui %86 : i1 to i32
        %c0_i32_56 = arith.constant 0 : i32
        %88 = arith.cmpi ne, %87, %c0_i32_56 : i32
        scf.if %88 {
          %158 = arith.addi %66, %82 : i32
          %c0_i32_90 = arith.constant 0 : i32
          %159 = tpu.memref_slice %arg7[%85, %c0_i32_90] : memref<64x128xf32, #tpu.memory_space<any>> -> memref<1x128xf32, #tpu.memory_space<any>>
          %c0_i32_91 = arith.constant 0 : i32
          %160 = tpu.memref_slice %arg9[%158, %c0_i32_91] : memref<32x128xf32, #tpu.memory_space<vmem>> -> memref<1x128xf32, #tpu.memory_space<vmem>>
          %161 = tpu.memref_slice %arg11[%64] : memref<2x!tpu.dma_semaphore, #tpu.memory_space<semaphore_mem>> -> memref<1x!tpu.dma_semaphore, #tpu.memory_space<semaphore_mem>>
          %162 = tpu.memref_squeeze %161 : memref<1x!tpu.dma_semaphore, #tpu.memory_space<semaphore_mem>> -> memref<!tpu.dma_semaphore, #tpu.memory_space<semaphore_mem>>
          tpu.enqueue_dma source(%159 : memref<1x128xf32, #tpu.memory_space<any>>) target(%160 : memref<1x128xf32, #tpu.memory_space<vmem>>) target_semaphore(%162 : memref<!tpu.dma_semaphore, #tpu.memory_space<semaphore_mem>>)
        } else {
        }
        %c1_i32_57 = arith.constant 1 : i32
        %89 = arith.cmpi eq, %85, %c1_i32_57 : i32
        %90 = arith.extui %89 : i1 to i32
        %c0_i32_58 = arith.constant 0 : i32
        %91 = arith.cmpi ne, %90, %c0_i32_58 : i32
        scf.if %91 {
          %158 = arith.addi %66, %82 : i32
          %159 = arith.index_cast %158 : i32 to index
          %c0_90 = arith.constant 0 : index
          %160 = vector.load %arg9[%159, %c0_90] : memref<32x128xf32, #tpu.memory_space<vmem>>, vector<1x128xf32>
          tpu.vector_store %arg9[%159, %c0_90], %0 {strides = array<i32>} : memref<32x128xf32, #tpu.memory_space<vmem>>, vector<1x128xf32>,
        } else {
        }
        %c8_i32_59 = arith.constant 8 : i32
        %92 = arith.muli %69, %c8_i32_59 : i32
        %c2_i32_60 = arith.constant 2 : i32
        %93 = arith.addi %92, %c2_i32_60 : i32
        %94 = arith.addi %65, %93 : i32
        %95 = arith.index_cast %94 : i32 to index
        %96 = memref.load %arg1[%95] : memref<32xi32, #tpu.memory_space<smem>>
        %c1_i32_61 = arith.constant 1 : i32
        %97 = arith.cmpi ne, %96, %c1_i32_61 : i32
        %98 = arith.extui %97 : i1 to i32
        %c0_i32_62 = arith.constant 0 : i32
        %99 = arith.cmpi ne, %98, %c0_i32_62 : i32
        scf.if %99 {
          %158 = arith.addi %66, %93 : i32
          %c0_i32_90 = arith.constant 0 : i32
          %159 = tpu.memref_slice %arg7[%96, %c0_i32_90] : memref<64x128xf32, #tpu.memory_space<any>> -> memref<1x128xf32, #tpu.memory_space<any>>
          %c0_i32_91 = arith.constant 0 : i32
          %160 = tpu.memref_slice %arg9[%158, %c0_i32_91] : memref<32x128xf32, #tpu.memory_space<vmem>> -> memref<1x128xf32, #tpu.memory_space<vmem>>
          %161 = tpu.memref_slice %arg11[%64] : memref<2x!tpu.dma_semaphore, #tpu.memory_space<semaphore_mem>> -> memref<1x!tpu.dma_semaphore, #tpu.memory_space<semaphore_mem>>
          %162 = tpu.memref_squeeze %161 : memref<1x!tpu.dma_semaphore, #tpu.memory_space<semaphore_mem>> -> memref<!tpu.dma_semaphore, #tpu.memory_space<semaphore_mem>>
          tpu.enqueue_dma source(%159 : memref<1x128xf32, #tpu.memory_space<any>>) target(%160 : memref<1x128xf32, #tpu.memory_space<vmem>>) target_semaphore(%162 : memref<!tpu.dma_semaphore, #tpu.memory_space<semaphore_mem>>)
        } else {
        }
        %c1_i32_63 = arith.constant 1 : i32
        %100 = arith.cmpi eq, %96, %c1_i32_63 : i32
        %101 = arith.extui %100 : i1 to i32
        %c0_i32_64 = arith.constant 0 : i32
        %102 = arith.cmpi ne, %101, %c0_i32_64 : i32
        scf.if %102 {
          %158 = arith.addi %66, %93 : i32
          %159 = arith.index_cast %158 : i32 to index
          %c0_90 = arith.constant 0 : index
          %160 = vector.load %arg9[%159, %c0_90] : memref<32x128xf32, #tpu.memory_space<vmem>>, vector<1x128xf32>
          tpu.vector_store %arg9[%159, %c0_90], %0 {strides = array<i32>} : memref<32x128xf32, #tpu.memory_space<vmem>>, vector<1x128xf32>,
        } else {
        }
        %c8_i32_65 = arith.constant 8 : i32
        %103 = arith.muli %69, %c8_i32_65 : i32
        %c3_i32 = arith.constant 3 : i32
        %104 = arith.addi %103, %c3_i32 : i32
        %105 = arith.addi %65, %104 : i32
        %106 = arith.index_cast %105 : i32 to index
        %107 = memref.load %arg1[%106] : memref<32xi32, #tpu.memory_space<smem>>
        %c1_i32_66 = arith.constant 1 : i32
        %108 = arith.cmpi ne, %107, %c1_i32_66 : i32
        %109 = arith.extui %108 : i1 to i32
        %c0_i32_67 = arith.constant 0 : i32
        %110 = arith.cmpi ne, %109, %c0_i32_67 : i32
        scf.if %110 {
          %158 = arith.addi %66, %104 : i32
          %c0_i32_90 = arith.constant 0 : i32
          %159 = tpu.memref_slice %arg7[%107, %c0_i32_90] : memref<64x128xf32, #tpu.memory_space<any>> -> memref<1x128xf32, #tpu.memory_space<any>>
          %c0_i32_91 = arith.constant 0 : i32
          %160 = tpu.memref_slice %arg9[%158, %c0_i32_91] : memref<32x128xf32, #tpu.memory_space<vmem>> -> memref<1x128xf32, #tpu.memory_space<vmem>>
          %161 = tpu.memref_slice %arg11[%64] : memref<2x!tpu.dma_semaphore, #tpu.memory_space<semaphore_mem>> -> memref<1x!tpu.dma_semaphore, #tpu.memory_space<semaphore_mem>>
          %162 = tpu.memref_squeeze %161 : memref<1x!tpu.dma_semaphore, #tpu.memory_space<semaphore_mem>> -> memref<!tpu.dma_semaphore, #tpu.memory_space<semaphore_mem>>
          tpu.enqueue_dma source(%159 : memref<1x128xf32, #tpu.memory_space<any>>) target(%160 : memref<1x128xf32, #tpu.memory_space<vmem>>) target_semaphore(%162 : memref<!tpu.dma_semaphore, #tpu.memory_space<semaphore_mem>>)
        } else {
        }
        %c1_i32_68 = arith.constant 1 : i32
        %111 = arith.cmpi eq, %107, %c1_i32_68 : i32
        %112 = arith.extui %111 : i1 to i32
        %c0_i32_69 = arith.constant 0 : i32
        %113 = arith.cmpi ne, %112, %c0_i32_69 : i32
        scf.if %113 {
          %158 = arith.addi %66, %104 : i32
          %159 = arith.index_cast %158 : i32 to index
          %c0_90 = arith.constant 0 : index
          %160 = vector.load %arg9[%159, %c0_90] : memref<32x128xf32, #tpu.memory_space<vmem>>, vector<1x128xf32>
          tpu.vector_store %arg9[%159, %c0_90], %0 {strides = array<i32>} : memref<32x128xf32, #tpu.memory_space<vmem>>, vector<1x128xf32>,
        } else {
        }
        %c8_i32_70 = arith.constant 8 : i32
        %114 = arith.muli %69, %c8_i32_70 : i32
        %c4_i32 = arith.constant 4 : i32
        %115 = arith.addi %114, %c4_i32 : i32
        %116 = arith.addi %65, %115 : i32
        %117 = arith.index_cast %116 : i32 to index
        %118 = memref.load %arg1[%117] : memref<32xi32, #tpu.memory_space<smem>>
        %c1_i32_71 = arith.constant 1 : i32
        %119 = arith.cmpi ne, %118, %c1_i32_71 : i32
        %120 = arith.extui %119 : i1 to i32
        %c0_i32_72 = arith.constant 0 : i32
        %121 = arith.cmpi ne, %120, %c0_i32_72 : i32
        scf.if %121 {
          %158 = arith.addi %66, %115 : i32
          %c0_i32_90 = arith.constant 0 : i32
          %159 = tpu.memref_slice %arg7[%118, %c0_i32_90] : memref<64x128xf32, #tpu.memory_space<any>> -> memref<1x128xf32, #tpu.memory_space<any>>
          %c0_i32_91 = arith.constant 0 : i32
          %160 = tpu.memref_slice %arg9[%158, %c0_i32_91] : memref<32x128xf32, #tpu.memory_space<vmem>> -> memref<1x128xf32, #tpu.memory_space<vmem>>
          %161 = tpu.memref_slice %arg11[%64] : memref<2x!tpu.dma_semaphore, #tpu.memory_space<semaphore_mem>> -> memref<1x!tpu.dma_semaphore, #tpu.memory_space<semaphore_mem>>
          %162 = tpu.memref_squeeze %161 : memref<1x!tpu.dma_semaphore, #tpu.memory_space<semaphore_mem>> -> memref<!tpu.dma_semaphore, #tpu.memory_space<semaphore_mem>>
          tpu.enqueue_dma source(%159 : memref<1x128xf32, #tpu.memory_space<any>>) target(%160 : memref<1x128xf32, #tpu.memory_space<vmem>>) target_semaphore(%162 : memref<!tpu.dma_semaphore, #tpu.memory_space<semaphore_mem>>)
        } else {
        }
        %c1_i32_73 = arith.constant 1 : i32
        %122 = arith.cmpi eq, %118, %c1_i32_73 : i32
        %123 = arith.extui %122 : i1 to i32
        %c0_i32_74 = arith.constant 0 : i32
        %124 = arith.cmpi ne, %123, %c0_i32_74 : i32
        scf.if %124 {
          %158 = arith.addi %66, %115 : i32
          %159 = arith.index_cast %158 : i32 to index
          %c0_90 = arith.constant 0 : index
          %160 = vector.load %arg9[%159, %c0_90] : memref<32x128xf32, #tpu.memory_space<vmem>>, vector<1x128xf32>
          tpu.vector_store %arg9[%159, %c0_90], %0 {strides = array<i32>} : memref<32x128xf32, #tpu.memory_space<vmem>>, vector<1x128xf32>,
        } else {
        }
        %c8_i32_75 = arith.constant 8 : i32
        %125 = arith.muli %69, %c8_i32_75 : i32
        %c5_i32 = arith.constant 5 : i32
        %126 = arith.addi %125, %c5_i32 : i32
        %127 = arith.addi %65, %126 : i32
        %128 = arith.index_cast %127 : i32 to index
        %129 = memref.load %arg1[%128] : memref<32xi32, #tpu.memory_space<smem>>
        %c1_i32_76 = arith.constant 1 : i32
        %130 = arith.cmpi ne, %129, %c1_i32_76 : i32
        %131 = arith.extui %130 : i1 to i32
        %c0_i32_77 = arith.constant 0 : i32
        %132 = arith.cmpi ne, %131, %c0_i32_77 : i32
        scf.if %132 {
          %158 = arith.addi %66, %126 : i32
          %c0_i32_90 = arith.constant 0 : i32
          %159 = tpu.memref_slice %arg7[%129, %c0_i32_90] : memref<64x128xf32, #tpu.memory_space<any>> -> memref<1x128xf32, #tpu.memory_space<any>>
          %c0_i32_91 = arith.constant 0 : i32
          %160 = tpu.memref_slice %arg9[%158, %c0_i32_91] : memref<32x128xf32, #tpu.memory_space<vmem>> -> memref<1x128xf32, #tpu.memory_space<vmem>>
          %161 = tpu.memref_slice %arg11[%64] : memref<2x!tpu.dma_semaphore, #tpu.memory_space<semaphore_mem>> -> memref<1x!tpu.dma_semaphore, #tpu.memory_space<semaphore_mem>>
          %162 = tpu.memref_squeeze %161 : memref<1x!tpu.dma_semaphore, #tpu.memory_space<semaphore_mem>> -> memref<!tpu.dma_semaphore, #tpu.memory_space<semaphore_mem>>
          tpu.enqueue_dma source(%159 : memref<1x128xf32, #tpu.memory_space<any>>) target(%160 : memref<1x128xf32, #tpu.memory_space<vmem>>) target_semaphore(%162 : memref<!tpu.dma_semaphore, #tpu.memory_space<semaphore_mem>>)
        } else {
        }
        %c1_i32_78 = arith.constant 1 : i32
        %133 = arith.cmpi eq, %129, %c1_i32_78 : i32
        %134 = arith.extui %133 : i1 to i32
        %c0_i32_79 = arith.constant 0 : i32
        %135 = arith.cmpi ne, %134, %c0_i32_79 : i32
        scf.if %135 {
          %158 = arith.addi %66, %126 : i32
          %159 = arith.index_cast %158 : i32 to index
          %c0_90 = arith.constant 0 : index
          %160 = vector.load %arg9[%159, %c0_90] : memref<32x128xf32, #tpu.memory_space<vmem>>, vector<1x128xf32>
          tpu.vector_store %arg9[%159, %c0_90], %0 {strides = array<i32>} : memref<32x128xf32, #tpu.memory_space<vmem>>, vector<1x128xf32>,
        } else {
        }
        %c8_i32_80 = arith.constant 8 : i32
        %136 = arith.muli %69, %c8_i32_80 : i32
        %c6_i32 = arith.constant 6 : i32
        %137 = arith.addi %136, %c6_i32 : i32
        %138 = arith.addi %65, %137 : i32
        %139 = arith.index_cast %138 : i32 to index
        %140 = memref.load %arg1[%139] : memref<32xi32, #tpu.memory_space<smem>>
        %c1_i32_81 = arith.constant 1 : i32
        %141 = arith.cmpi ne, %140, %c1_i32_81 : i32
        %142 = arith.extui %141 : i1 to i32
        %c0_i32_82 = arith.constant 0 : i32
        %143 = arith.cmpi ne, %142, %c0_i32_82 : i32
        scf.if %143 {
          %158 = arith.addi %66, %137 : i32
          %c0_i32_90 = arith.constant 0 : i32
          %159 = tpu.memref_slice %arg7[%140, %c0_i32_90] : memref<64x128xf32, #tpu.memory_space<any>> -> memref<1x128xf32, #tpu.memory_space<any>>
          %c0_i32_91 = arith.constant 0 : i32
          %160 = tpu.memref_slice %arg9[%158, %c0_i32_91] : memref<32x128xf32, #tpu.memory_space<vmem>> -> memref<1x128xf32, #tpu.memory_space<vmem>>
          %161 = tpu.memref_slice %arg11[%64] : memref<2x!tpu.dma_semaphore, #tpu.memory_space<semaphore_mem>> -> memref<1x!tpu.dma_semaphore, #tpu.memory_space<semaphore_mem>>
          %162 = tpu.memref_squeeze %161 : memref<1x!tpu.dma_semaphore, #tpu.memory_space<semaphore_mem>> -> memref<!tpu.dma_semaphore, #tpu.memory_space<semaphore_mem>>
          tpu.enqueue_dma source(%159 : memref<1x128xf32, #tpu.memory_space<any>>) target(%160 : memref<1x128xf32, #tpu.memory_space<vmem>>) target_semaphore(%162 : memref<!tpu.dma_semaphore, #tpu.memory_space<semaphore_mem>>)
        } else {
        }
        %c1_i32_83 = arith.constant 1 : i32
        %144 = arith.cmpi eq, %140, %c1_i32_83 : i32
        %145 = arith.extui %144 : i1 to i32
        %c0_i32_84 = arith.constant 0 : i32
        %146 = arith.cmpi ne, %145, %c0_i32_84 : i32
        scf.if %146 {
          %158 = arith.addi %66, %137 : i32
          %159 = arith.index_cast %158 : i32 to index
          %c0_90 = arith.constant 0 : index
          %160 = vector.load %arg9[%159, %c0_90] : memref<32x128xf32, #tpu.memory_space<vmem>>, vector<1x128xf32>
          tpu.vector_store %arg9[%159, %c0_90], %0 {strides = array<i32>} : memref<32x128xf32, #tpu.memory_space<vmem>>, vector<1x128xf32>,
        } else {
        }
        %c8_i32_85 = arith.constant 8 : i32
        %147 = arith.muli %69, %c8_i32_85 : i32
        %c7_i32 = arith.constant 7 : i32
        %148 = arith.addi %147, %c7_i32 : i32
        %149 = arith.addi %65, %148 : i32
        %150 = arith.index_cast %149 : i32 to index
        %151 = memref.load %arg1[%150] : memref<32xi32, #tpu.memory_space<smem>>
        %c1_i32_86 = arith.constant 1 : i32
        %152 = arith.cmpi ne, %151, %c1_i32_86 : i32
        %153 = arith.extui %152 : i1 to i32
        %c0_i32_87 = arith.constant 0 : i32
        %154 = arith.cmpi ne, %153, %c0_i32_87 : i32
        scf.if %154 {
          %158 = arith.addi %66, %148 : i32
          %c0_i32_90 = arith.constant 0 : i32
          %159 = tpu.memref_slice %arg7[%151, %c0_i32_90] : memref<64x128xf32, #tpu.memory_space<any>> -> memref<1x128xf32, #tpu.memory_space<any>>
          %c0_i32_91 = arith.constant 0 : i32
          %160 = tpu.memref_slice %arg9[%158, %c0_i32_91] : memref<32x128xf32, #tpu.memory_space<vmem>> -> memref<1x128xf32, #tpu.memory_space<vmem>>
          %161 = tpu.memref_slice %arg11[%64] : memref<2x!tpu.dma_semaphore, #tpu.memory_space<semaphore_mem>> -> memref<1x!tpu.dma_semaphore, #tpu.memory_space<semaphore_mem>>
          %162 = tpu.memref_squeeze %161 : memref<1x!tpu.dma_semaphore, #tpu.memory_space<semaphore_mem>> -> memref<!tpu.dma_semaphore, #tpu.memory_space<semaphore_mem>>
          tpu.enqueue_dma source(%159 : memref<1x128xf32, #tpu.memory_space<any>>) target(%160 : memref<1x128xf32, #tpu.memory_space<vmem>>) target_semaphore(%162 : memref<!tpu.dma_semaphore, #tpu.memory_space<semaphore_mem>>)
        } else {
        }
        %c1_i32_88 = arith.constant 1 : i32
        %155 = arith.cmpi eq, %151, %c1_i32_88 : i32
        %156 = arith.extui %155 : i1 to i32
        %c0_i32_89 = arith.constant 0 : i32
        %157 = arith.cmpi ne, %156, %c0_i32_89 : i32
        scf.if %157 {
          %158 = arith.addi %66, %148 : i32
          %159 = arith.index_cast %158 : i32 to index
          %c0_90 = arith.constant 0 : index
          %160 = vector.load %arg9[%159, %c0_90] : memref<32x128xf32, #tpu.memory_space<vmem>>, vector<1x128xf32>
          tpu.vector_store %arg9[%159, %c0_90], %0 {strides = array<i32>} : memref<32x128xf32, #tpu.memory_space<vmem>>, vector<1x128xf32>,
        } else {
        }
      }
      %c2_i32_45 = arith.constant 2 : i32
    } else {
    }
    %c2_i32_2 = arith.constant 2 : i32
    %c0_i32_3 = arith.constant 0 : i32
    %8 = arith.cmpi eq, %c2_i32_2, %c0_i32_3 : i32
    %c1_i32_4 = arith.constant 1 : i32
    %9 = arith.select %8, %c1_i32_4, %c2_i32_2 : i32
    %10 = arith.remsi %arg0, %9 : i32
    %c0_i32_5 = arith.constant 0 : i32
    %11 = arith.cmpi ne, %10, %c0_i32_5 : i32
    %c0_i32_6 = arith.constant 0 : i32
    %12 = arith.cmpi slt, %10, %c0_i32_6 : i32
    %c0_i32_7 = arith.constant 0 : i32
    %13 = arith.cmpi slt, %9, %c0_i32_7 : i32
    %14 = arith.xori %12, %13 : i1
    %15 = arith.andi %14, %11 : i1
    %16 = arith.addi %10, %9 : i32
    %17 = arith.select %15, %16, %10 : i32
    %c16_i32 = arith.constant 16 : i32
    %18 = arith.muli %arg0, %c16_i32 : i32
    %c0_i32_8 = arith.constant 0 : i32
    %c2_i32_9 = arith.constant 2 : i32
    %19 = arith.addi %c0_i32_8, %c2_i32_9 : i32
    %c1_i32_10 = arith.constant 1 : i32
    scf.for %arg12 = %c0_i32_8 to %19 step %c1_i32_10  : i32 {
      %c1_i32_32 = arith.constant 1 : i32
      %53 = arith.muli %arg12, %c1_i32_32 : i32
      %c0_i32_33 = arith.constant 0 : i32
      %54 = arith.addi %c0_i32_33, %53 : i32
      %c8_i32 = arith.constant 8 : i32
      %55 = arith.muli %54, %c8_i32 : i32
      %c0_i32_34 = arith.constant 0 : i32
      %56 = arith.addi %55, %c0_i32_34 : i32
      %57 = arith.addi %18, %56 : i32
      %58 = arith.index_cast %57 : i32 to index
      %59 = memref.load %arg2[%58] : memref<32xi32, #tpu.memory_space<smem>>
      %60 = arith.index_cast %59 : i32 to index
      %c0_35 = arith.constant 0 : index
      %61 = vector.load %arg4[%60, %c0_35] : memref<40x128xf32, #tpu.memory_space<vmem>>, vector<1x128xf32>
      %62 = arith.index_cast %56 : i32 to index
      %c0_36 = arith.constant 0 : index
      %63 = vector.load %arg10[%62, %c0_36] : memref<16x128xf32, #tpu.memory_space<vmem>>, vector<1x128xf32>
      tpu.vector_store %arg10[%62, %c0_36], %61 {strides = array<i32>} : memref<16x128xf32, #tpu.memory_space<vmem>>, vector<1x128xf32>,
      %c8_i32_37 = arith.constant 8 : i32
      %64 = arith.muli %54, %c8_i32_37 : i32
      %c1_i32_38 = arith.constant 1 : i32
      %65 = arith.addi %64, %c1_i32_38 : i32
      %66 = arith.addi %18, %65 : i32
      %67 = arith.index_cast %66 : i32 to index
      %68 = memref.load %arg2[%67] : memref<32xi32, #tpu.memory_space<smem>>
      %69 = arith.index_cast %68 : i32 to index
      %c0_39 = arith.constant 0 : index
      %70 = vector.load %arg4[%69, %c0_39] : memref<40x128xf32, #tpu.memory_space<vmem>>, vector<1x128xf32>
      %71 = arith.index_cast %65 : i32 to index
      %c0_40 = arith.constant 0 : index
      %72 = vector.load %arg10[%71, %c0_40] : memref<16x128xf32, #tpu.memory_space<vmem>>, vector<1x128xf32>
      tpu.vector_store %arg10[%71, %c0_40], %70 {strides = array<i32>} : memref<16x128xf32, #tpu.memory_space<vmem>>, vector<1x128xf32>,
      %c8_i32_41 = arith.constant 8 : i32
      %73 = arith.muli %54, %c8_i32_41 : i32
      %c2_i32_42 = arith.constant 2 : i32
      %74 = arith.addi %73, %c2_i32_42 : i32
      %75 = arith.addi %18, %74 : i32
      %76 = arith.index_cast %75 : i32 to index
      %77 = memref.load %arg2[%76] : memref<32xi32, #tpu.memory_space<smem>>
      %78 = arith.index_cast %77 : i32 to index
      %c0_43 = arith.constant 0 : index
      %79 = vector.load %arg4[%78, %c0_43] : memref<40x128xf32, #tpu.memory_space<vmem>>, vector<1x128xf32>
      %80 = arith.index_cast %74 : i32 to index
      %c0_44 = arith.constant 0 : index
      %81 = vector.load %arg10[%80, %c0_44] : memref<16x128xf32, #tpu.memory_space<vmem>>, vector<1x128xf32>
      tpu.vector_store %arg10[%80, %c0_44], %79 {strides = array<i32>} : memref<16x128xf32, #tpu.memory_space<vmem>>, vector<1x128xf32>,
      %c8_i32_45 = arith.constant 8 : i32
      %82 = arith.muli %54, %c8_i32_45 : i32
      %c3_i32 = arith.constant 3 : i32
      %83 = arith.addi %82, %c3_i32 : i32
      %84 = arith.addi %18, %83 : i32
      %85 = arith.index_cast %84 : i32 to index
      %86 = memref.load %arg2[%85] : memref<32xi32, #tpu.memory_space<smem>>
      %87 = arith.index_cast %86 : i32 to index
      %c0_46 = arith.constant 0 : index
      %88 = vector.load %arg4[%87, %c0_46] : memref<40x128xf32, #tpu.memory_space<vmem>>, vector<1x128xf32>
      %89 = arith.index_cast %83 : i32 to index
      %c0_47 = arith.constant 0 : index
      %90 = vector.load %arg10[%89, %c0_47] : memref<16x128xf32, #tpu.memory_space<vmem>>, vector<1x128xf32>
      tpu.vector_store %arg10[%89, %c0_47], %88 {strides = array<i32>} : memref<16x128xf32, #tpu.memory_space<vmem>>, vector<1x128xf32>,
      %c8_i32_48 = arith.constant 8 : i32
      %91 = arith.muli %54, %c8_i32_48 : i32
      %c4_i32 = arith.constant 4 : i32
      %92 = arith.addi %91, %c4_i32 : i32
      %93 = arith.addi %18, %92 : i32
      %94 = arith.index_cast %93 : i32 to index
      %95 = memref.load %arg2[%94] : memref<32xi32, #tpu.memory_space<smem>>
      %96 = arith.index_cast %95 : i32 to index
      %c0_49 = arith.constant 0 : index
      %97 = vector.load %arg4[%96, %c0_49] : memref<40x128xf32, #tpu.memory_space<vmem>>, vector<1x128xf32>
      %98 = arith.index_cast %92 : i32 to index
      %c0_50 = arith.constant 0 : index
      %99 = vector.load %arg10[%98, %c0_50] : memref<16x128xf32, #tpu.memory_space<vmem>>, vector<1x128xf32>
      tpu.vector_store %arg10[%98, %c0_50], %97 {strides = array<i32>} : memref<16x128xf32, #tpu.memory_space<vmem>>, vector<1x128xf32>,
      %c8_i32_51 = arith.constant 8 : i32
      %100 = arith.muli %54, %c8_i32_51 : i32
      %c5_i32 = arith.constant 5 : i32
      %101 = arith.addi %100, %c5_i32 : i32
      %102 = arith.addi %18, %101 : i32
      %103 = arith.index_cast %102 : i32 to index
      %104 = memref.load %arg2[%103] : memref<32xi32, #tpu.memory_space<smem>>
      %105 = arith.index_cast %104 : i32 to index
      %c0_52 = arith.constant 0 : index
      %106 = vector.load %arg4[%105, %c0_52] : memref<40x128xf32, #tpu.memory_space<vmem>>, vector<1x128xf32>
      %107 = arith.index_cast %101 : i32 to index
      %c0_53 = arith.constant 0 : index
      %108 = vector.load %arg10[%107, %c0_53] : memref<16x128xf32, #tpu.memory_space<vmem>>, vector<1x128xf32>
      tpu.vector_store %arg10[%107, %c0_53], %106 {strides = array<i32>} : memref<16x128xf32, #tpu.memory_space<vmem>>, vector<1x128xf32>,
      %c8_i32_54 = arith.constant 8 : i32
      %109 = arith.muli %54, %c8_i32_54 : i32
      %c6_i32 = arith.constant 6 : i32
      %110 = arith.addi %109, %c6_i32 : i32
      %111 = arith.addi %18, %110 : i32
      %112 = arith.index_cast %111 : i32 to index
      %113 = memref.load %arg2[%112] : memref<32xi32, #tpu.memory_space<smem>>
      %114 = arith.index_cast %113 : i32 to index
      %c0_55 = arith.constant 0 : index
      %115 = vector.load %arg4[%114, %c0_55] : memref<40x128xf32, #tpu.memory_space<vmem>>, vector<1x128xf32>
      %116 = arith.index_cast %110 : i32 to index
      %c0_56 = arith.constant 0 : index
      %117 = vector.load %arg10[%116, %c0_56] : memref<16x128xf32, #tpu.memory_space<vmem>>, vector<1x128xf32>
      tpu.vector_store %arg10[%116, %c0_56], %115 {strides = array<i32>} : memref<16x128xf32, #tpu.memory_space<vmem>>, vector<1x128xf32>,
      %c8_i32_57 = arith.constant 8 : i32
      %118 = arith.muli %54, %c8_i32_57 : i32
      %c7_i32 = arith.constant 7 : i32
      %119 = arith.addi %118, %c7_i32 : i32
      %120 = arith.addi %18, %119 : i32
      %121 = arith.index_cast %120 : i32 to index
      %122 = memref.load %arg2[%121] : memref<32xi32, #tpu.memory_space<smem>>
      %123 = arith.index_cast %122 : i32 to index
      %c0_58 = arith.constant 0 : index
      %124 = vector.load %arg4[%123, %c0_58] : memref<40x128xf32, #tpu.memory_space<vmem>>, vector<1x128xf32>
      %125 = arith.index_cast %119 : i32 to index
      %c0_59 = arith.constant 0 : index
      %126 = vector.load %arg10[%125, %c0_59] : memref<16x128xf32, #tpu.memory_space<vmem>>, vector<1x128xf32>
      tpu.vector_store %arg10[%125, %c0_59], %124 {strides = array<i32>} : memref<16x128xf32, #tpu.memory_space<vmem>>, vector<1x128xf32>,
    }
    %c2_i32_11 = arith.constant 2 : i32
    %c0 = arith.constant 0 : index
    %c0_12 = arith.constant 0 : index
    %20 = vector.load %arg10[%c0, %c0_12] : memref<16x128xf32, #tpu.memory_space<vmem>>, vector<16x128xf32>
    %c16_i32_13 = arith.constant 16 : i32
    %21 = arith.muli %arg0, %c16_i32_13 : i32
    %c16_i32_14 = arith.constant 16 : i32
    %22 = arith.muli %17, %c16_i32_14 : i32
    %c0_i32_15 = arith.constant 0 : i32
    %c2_i32_16 = arith.constant 2 : i32
    %23 = arith.addi %c0_i32_15, %c2_i32_16 : i32
    %c1_i32_17 = arith.constant 1 : i32
    scf.for %arg12 = %c0_i32_15 to %23 step %c1_i32_17  : i32 {
      %c1_i32_32 = arith.constant 1 : i32
      %53 = arith.muli %arg12, %c1_i32_32 : i32
      %c0_i32_33 = arith.constant 0 : i32
      %54 = arith.addi %c0_i32_33, %53 : i32
      %c8_i32 = arith.constant 8 : i32
      %55 = arith.muli %54, %c8_i32 : i32
      %c0_i32_34 = arith.constant 0 : i32
      %56 = arith.addi %55, %c0_i32_34 : i32
      %57 = arith.addi %21, %56 : i32
      %58 = arith.index_cast %57 : i32 to index
      %59 = memref.load %arg1[%58] : memref<32xi32, #tpu.memory_space<smem>>
      %c1_i32_35 = arith.constant 1 : i32
      %60 = arith.cmpi ne, %59, %c1_i32_35 : i32
      %61 = arith.extui %60 : i1 to i32
      %c0_i32_36 = arith.constant 0 : i32
      %62 = arith.cmpi ne, %61, %c0_i32_36 : i32
      scf.if %62 {
        %119 = arith.addi %22, %56 : i32
        %c0_i32_60 = arith.constant 0 : i32
        %120 = tpu.memref_slice %arg7[%59, %c0_i32_60] : memref<64x128xf32, #tpu.memory_space<any>> -> memref<1x128xf32, #tpu.memory_space<any>>
        %c0_i32_61 = arith.constant 0 : i32
        %121 = tpu.memref_slice %arg9[%119, %c0_i32_61] : memref<32x128xf32, #tpu.memory_space<vmem>> -> memref<1x128xf32, #tpu.memory_space<vmem>>
        %122 = tpu.memref_slice %arg11[%17] : memref<2x!tpu.dma_semaphore, #tpu.memory_space<semaphore_mem>> -> memref<1x!tpu.dma_semaphore, #tpu.memory_space<semaphore_mem>>
        %123 = tpu.memref_squeeze %122 : memref<1x!tpu.dma_semaphore, #tpu.memory_space<semaphore_mem>> -> memref<!tpu.dma_semaphore, #tpu.memory_space<semaphore_mem>>
        tpu.wait_dma2 semaphore(%123 : memref<!tpu.dma_semaphore, #tpu.memory_space<semaphore_mem>>) src(%120 : memref<1x128xf32, #tpu.memory_space<any>>) dst(%121 : memref<1x128xf32, #tpu.memory_space<vmem>>)
      } else {
      }
      %c8_i32_37 = arith.constant 8 : i32
      %63 = arith.muli %54, %c8_i32_37 : i32
      %c1_i32_38 = arith.constant 1 : i32
      %64 = arith.addi %63, %c1_i32_38 : i32
      %65 = arith.addi %21, %64 : i32
      %66 = arith.index_cast %65 : i32 to index
      %67 = memref.load %arg1[%66] : memref<32xi32, #tpu.memory_space<smem>>
      %c1_i32_39 = arith.constant 1 : i32
      %68 = arith.cmpi ne, %67, %c1_i32_39 : i32
      %69 = arith.extui %68 : i1 to i32
      %c0_i32_40 = arith.constant 0 : i32
      %70 = arith.cmpi ne, %69, %c0_i32_40 : i32
      scf.if %70 {
        %119 = arith.addi %22, %64 : i32
        %c0_i32_60 = arith.constant 0 : i32
        %120 = tpu.memref_slice %arg7[%67, %c0_i32_60] : memref<64x128xf32, #tpu.memory_space<any>> -> memref<1x128xf32, #tpu.memory_space<any>>
        %c0_i32_61 = arith.constant 0 : i32
        %121 = tpu.memref_slice %arg9[%119, %c0_i32_61] : memref<32x128xf32, #tpu.memory_space<vmem>> -> memref<1x128xf32, #tpu.memory_space<vmem>>
        %122 = tpu.memref_slice %arg11[%17] : memref<2x!tpu.dma_semaphore, #tpu.memory_space<semaphore_mem>> -> memref<1x!tpu.dma_semaphore, #tpu.memory_space<semaphore_mem>>
        %123 = tpu.memref_squeeze %122 : memref<1x!tpu.dma_semaphore, #tpu.memory_space<semaphore_mem>> -> memref<!tpu.dma_semaphore, #tpu.memory_space<semaphore_mem>>
        tpu.wait_dma2 semaphore(%123 : memref<!tpu.dma_semaphore, #tpu.memory_space<semaphore_mem>>) src(%120 : memref<1x128xf32, #tpu.memory_space<any>>) dst(%121 : memref<1x128xf32, #tpu.memory_space<vmem>>)
      } else {
      }
      %c8_i32_41 = arith.constant 8 : i32
      %71 = arith.muli %54, %c8_i32_41 : i32
      %c2_i32_42 = arith.constant 2 : i32
      %72 = arith.addi %71, %c2_i32_42 : i32
      %73 = arith.addi %21, %72 : i32
      %74 = arith.index_cast %73 : i32 to index
      %75 = memref.load %arg1[%74] : memref<32xi32, #tpu.memory_space<smem>>
      %c1_i32_43 = arith.constant 1 : i32
      %76 = arith.cmpi ne, %75, %c1_i32_43 : i32
      %77 = arith.extui %76 : i1 to i32
      %c0_i32_44 = arith.constant 0 : i32
      %78 = arith.cmpi ne, %77, %c0_i32_44 : i32
      scf.if %78 {
        %119 = arith.addi %22, %72 : i32
        %c0_i32_60 = arith.constant 0 : i32
        %120 = tpu.memref_slice %arg7[%75, %c0_i32_60] : memref<64x128xf32, #tpu.memory_space<any>> -> memref<1x128xf32, #tpu.memory_space<any>>
        %c0_i32_61 = arith.constant 0 : i32
        %121 = tpu.memref_slice %arg9[%119, %c0_i32_61] : memref<32x128xf32, #tpu.memory_space<vmem>> -> memref<1x128xf32, #tpu.memory_space<vmem>>
        %122 = tpu.memref_slice %arg11[%17] : memref<2x!tpu.dma_semaphore, #tpu.memory_space<semaphore_mem>> -> memref<1x!tpu.dma_semaphore, #tpu.memory_space<semaphore_mem>>
        %123 = tpu.memref_squeeze %122 : memref<1x!tpu.dma_semaphore, #tpu.memory_space<semaphore_mem>> -> memref<!tpu.dma_semaphore, #tpu.memory_space<semaphore_mem>>
        tpu.wait_dma2 semaphore(%123 : memref<!tpu.dma_semaphore, #tpu.memory_space<semaphore_mem>>) src(%120 : memref<1x128xf32, #tpu.memory_space<any>>) dst(%121 : memref<1x128xf32, #tpu.memory_space<vmem>>)
      } else {
      }
      %c8_i32_45 = arith.constant 8 : i32
      %79 = arith.muli %54, %c8_i32_45 : i32
      %c3_i32 = arith.constant 3 : i32
      %80 = arith.addi %79, %c3_i32 : i32
      %81 = arith.addi %21, %80 : i32
      %82 = arith.index_cast %81 : i32 to index
      %83 = memref.load %arg1[%82] : memref<32xi32, #tpu.memory_space<smem>>
      %c1_i32_46 = arith.constant 1 : i32
      %84 = arith.cmpi ne, %83, %c1_i32_46 : i32
      %85 = arith.extui %84 : i1 to i32
      %c0_i32_47 = arith.constant 0 : i32
      %86 = arith.cmpi ne, %85, %c0_i32_47 : i32
      scf.if %86 {
        %119 = arith.addi %22, %80 : i32
        %c0_i32_60 = arith.constant 0 : i32
        %120 = tpu.memref_slice %arg7[%83, %c0_i32_60] : memref<64x128xf32, #tpu.memory_space<any>> -> memref<1x128xf32, #tpu.memory_space<any>>
        %c0_i32_61 = arith.constant 0 : i32
        %121 = tpu.memref_slice %arg9[%119, %c0_i32_61] : memref<32x128xf32, #tpu.memory_space<vmem>> -> memref<1x128xf32, #tpu.memory_space<vmem>>
        %122 = tpu.memref_slice %arg11[%17] : memref<2x!tpu.dma_semaphore, #tpu.memory_space<semaphore_mem>> -> memref<1x!tpu.dma_semaphore, #tpu.memory_space<semaphore_mem>>
        %123 = tpu.memref_squeeze %122 : memref<1x!tpu.dma_semaphore, #tpu.memory_space<semaphore_mem>> -> memref<!tpu.dma_semaphore, #tpu.memory_space<semaphore_mem>>
        tpu.wait_dma2 semaphore(%123 : memref<!tpu.dma_semaphore, #tpu.memory_space<semaphore_mem>>) src(%120 : memref<1x128xf32, #tpu.memory_space<any>>) dst(%121 : memref<1x128xf32, #tpu.memory_space<vmem>>)
      } else {
      }
      %c8_i32_48 = arith.constant 8 : i32
      %87 = arith.muli %54, %c8_i32_48 : i32
      %c4_i32 = arith.constant 4 : i32
      %88 = arith.addi %87, %c4_i32 : i32
      %89 = arith.addi %21, %88 : i32
      %90 = arith.index_cast %89 : i32 to index
      %91 = memref.load %arg1[%90] : memref<32xi32, #tpu.memory_space<smem>>
      %c1_i32_49 = arith.constant 1 : i32
      %92 = arith.cmpi ne, %91, %c1_i32_49 : i32
      %93 = arith.extui %92 : i1 to i32
      %c0_i32_50 = arith.constant 0 : i32
      %94 = arith.cmpi ne, %93, %c0_i32_50 : i32
      scf.if %94 {
        %119 = arith.addi %22, %88 : i32
        %c0_i32_60 = arith.constant 0 : i32
        %120 = tpu.memref_slice %arg7[%91, %c0_i32_60] : memref<64x128xf32, #tpu.memory_space<any>> -> memref<1x128xf32, #tpu.memory_space<any>>
        %c0_i32_61 = arith.constant 0 : i32
        %121 = tpu.memref_slice %arg9[%119, %c0_i32_61] : memref<32x128xf32, #tpu.memory_space<vmem>> -> memref<1x128xf32, #tpu.memory_space<vmem>>
        %122 = tpu.memref_slice %arg11[%17] : memref<2x!tpu.dma_semaphore, #tpu.memory_space<semaphore_mem>> -> memref<1x!tpu.dma_semaphore, #tpu.memory_space<semaphore_mem>>
        %123 = tpu.memref_squeeze %122 : memref<1x!tpu.dma_semaphore, #tpu.memory_space<semaphore_mem>> -> memref<!tpu.dma_semaphore, #tpu.memory_space<semaphore_mem>>
        tpu.wait_dma2 semaphore(%123 : memref<!tpu.dma_semaphore, #tpu.memory_space<semaphore_mem>>) src(%120 : memref<1x128xf32, #tpu.memory_space<any>>) dst(%121 : memref<1x128xf32, #tpu.memory_space<vmem>>)
      } else {
      }
      %c8_i32_51 = arith.constant 8 : i32
      %95 = arith.muli %54, %c8_i32_51 : i32
      %c5_i32 = arith.constant 5 : i32
      %96 = arith.addi %95, %c5_i32 : i32
      %97 = arith.addi %21, %96 : i32
      %98 = arith.index_cast %97 : i32 to index
      %99 = memref.load %arg1[%98] : memref<32xi32, #tpu.memory_space<smem>>
      %c1_i32_52 = arith.constant 1 : i32
      %100 = arith.cmpi ne, %99, %c1_i32_52 : i32
      %101 = arith.extui %100 : i1 to i32
      %c0_i32_53 = arith.constant 0 : i32
      %102 = arith.cmpi ne, %101, %c0_i32_53 : i32
      scf.if %102 {
        %119 = arith.addi %22, %96 : i32
        %c0_i32_60 = arith.constant 0 : i32
        %120 = tpu.memref_slice %arg7[%99, %c0_i32_60] : memref<64x128xf32, #tpu.memory_space<any>> -> memref<1x128xf32, #tpu.memory_space<any>>
        %c0_i32_61 = arith.constant 0 : i32
        %121 = tpu.memref_slice %arg9[%119, %c0_i32_61] : memref<32x128xf32, #tpu.memory_space<vmem>> -> memref<1x128xf32, #tpu.memory_space<vmem>>
        %122 = tpu.memref_slice %arg11[%17] : memref<2x!tpu.dma_semaphore, #tpu.memory_space<semaphore_mem>> -> memref<1x!tpu.dma_semaphore, #tpu.memory_space<semaphore_mem>>
        %123 = tpu.memref_squeeze %122 : memref<1x!tpu.dma_semaphore, #tpu.memory_space<semaphore_mem>> -> memref<!tpu.dma_semaphore, #tpu.memory_space<semaphore_mem>>
        tpu.wait_dma2 semaphore(%123 : memref<!tpu.dma_semaphore, #tpu.memory_space<semaphore_mem>>) src(%120 : memref<1x128xf32, #tpu.memory_space<any>>) dst(%121 : memref<1x128xf32, #tpu.memory_space<vmem>>)
      } else {
      }
      %c8_i32_54 = arith.constant 8 : i32
      %103 = arith.muli %54, %c8_i32_54 : i32
      %c6_i32 = arith.constant 6 : i32
      %104 = arith.addi %103, %c6_i32 : i32
      %105 = arith.addi %21, %104 : i32
      %106 = arith.index_cast %105 : i32 to index
      %107 = memref.load %arg1[%106] : memref<32xi32, #tpu.memory_space<smem>>
      %c1_i32_55 = arith.constant 1 : i32
      %108 = arith.cmpi ne, %107, %c1_i32_55 : i32
      %109 = arith.extui %108 : i1 to i32
      %c0_i32_56 = arith.constant 0 : i32
      %110 = arith.cmpi ne, %109, %c0_i32_56 : i32
      scf.if %110 {
        %119 = arith.addi %22, %104 : i32
        %c0_i32_60 = arith.constant 0 : i32
        %120 = tpu.memref_slice %arg7[%107, %c0_i32_60] : memref<64x128xf32, #tpu.memory_space<any>> -> memref<1x128xf32, #tpu.memory_space<any>>
        %c0_i32_61 = arith.constant 0 : i32
        %121 = tpu.memref_slice %arg9[%119, %c0_i32_61] : memref<32x128xf32, #tpu.memory_space<vmem>> -> memref<1x128xf32, #tpu.memory_space<vmem>>
        %122 = tpu.memref_slice %arg11[%17] : memref<2x!tpu.dma_semaphore, #tpu.memory_space<semaphore_mem>> -> memref<1x!tpu.dma_semaphore, #tpu.memory_space<semaphore_mem>>
        %123 = tpu.memref_squeeze %122 : memref<1x!tpu.dma_semaphore, #tpu.memory_space<semaphore_mem>> -> memref<!tpu.dma_semaphore, #tpu.memory_space<semaphore_mem>>
        tpu.wait_dma2 semaphore(%123 : memref<!tpu.dma_semaphore, #tpu.memory_space<semaphore_mem>>) src(%120 : memref<1x128xf32, #tpu.memory_space<any>>) dst(%121 : memref<1x128xf32, #tpu.memory_space<vmem>>)
      } else {
      }
      %c8_i32_57 = arith.constant 8 : i32
      %111 = arith.muli %54, %c8_i32_57 : i32
      %c7_i32 = arith.constant 7 : i32
      %112 = arith.addi %111, %c7_i32 : i32
      %113 = arith.addi %21, %112 : i32
      %114 = arith.index_cast %113 : i32 to index
      %115 = memref.load %arg1[%114] : memref<32xi32, #tpu.memory_space<smem>>
      %c1_i32_58 = arith.constant 1 : i32
      %116 = arith.cmpi ne, %115, %c1_i32_58 : i32
      %117 = arith.extui %116 : i1 to i32
      %c0_i32_59 = arith.constant 0 : i32
      %118 = arith.cmpi ne, %117, %c0_i32_59 : i32
      scf.if %118 {
        %119 = arith.addi %22, %112 : i32
        %c0_i32_60 = arith.constant 0 : i32
        %120 = tpu.memref_slice %arg7[%115, %c0_i32_60] : memref<64x128xf32, #tpu.memory_space<any>> -> memref<1x128xf32, #tpu.memory_space<any>>
        %c0_i32_61 = arith.constant 0 : i32
        %121 = tpu.memref_slice %arg9[%119, %c0_i32_61] : memref<32x128xf32, #tpu.memory_space<vmem>> -> memref<1x128xf32, #tpu.memory_space<vmem>>
        %122 = tpu.memref_slice %arg11[%17] : memref<2x!tpu.dma_semaphore, #tpu.memory_space<semaphore_mem>> -> memref<1x!tpu.dma_semaphore, #tpu.memory_space<semaphore_mem>>
        %123 = tpu.memref_squeeze %122 : memref<1x!tpu.dma_semaphore, #tpu.memory_space<semaphore_mem>> -> memref<!tpu.dma_semaphore, #tpu.memory_space<semaphore_mem>>
        tpu.wait_dma2 semaphore(%123 : memref<!tpu.dma_semaphore, #tpu.memory_space<semaphore_mem>>) src(%120 : memref<1x128xf32, #tpu.memory_space<any>>) dst(%121 : memref<1x128xf32, #tpu.memory_space<vmem>>)
      } else {
      }
    }
    %c2_i32_18 = arith.constant 2 : i32
    %c16_i32_19 = arith.constant 16 : i32
    %24 = arith.muli %17, %c16_i32_19 : i32
    %25 = tpu.assume_multiple %24, 8 : i32
    %26 = arith.index_cast %25 : i32 to index
    %c0_20 = arith.constant 0 : index
    %27 = vector.load %arg9[%26, %c0_20] : memref<32x128xf32, #tpu.memory_space<vmem>>, vector<16x128xf32>
    %28 = arith.addf %27, %20 : vector<16x128xf32>
    %cst_21 = arith.constant dense<0.000000e+00> : vector<16xf32>
    %29 = vector.multi_reduction <add>, %28, %cst_21 [1] : vector<16x128xf32> to vector<16xf32>
    %30 = vector.shape_cast %29 : vector<16xf32> to vector<16x1xf32>
    %cst_22 = arith.constant 1.280000e+02 : f32
    %31 = vector.broadcast %cst_22 : f32 to vector<16x1xf32>
    %32 = arith.divf %30, %31 : vector<16x1xf32>
    %33 = vector.broadcast %32 : vector<16x1xf32> to vector<16x128xf32>
    %34 = arith.subf %28, %33 : vector<16x128xf32>
    %35 = arith.mulf %34, %34 : vector<16x128xf32>
    %cst_23 = arith.constant dense<0.000000e+00> : vector<16xf32>
    %36 = vector.multi_reduction <add>, %35, %cst_23 [1] : vector<16x128xf32> to vector<16xf32>
    %37 = vector.shape_cast %36 : vector<16xf32> to vector<16x1xf32>
    %cst_24 = arith.constant 1.280000e+02 : f32
    %38 = vector.broadcast %cst_24 : f32 to vector<16x1xf32>
    %39 = arith.divf %37, %38 : vector<16x1xf32>
    %cst_25 = arith.constant 9.99999974E-6 : f32
    %40 = vector.broadcast %cst_25 : f32 to vector<16x1xf32>
    %41 = arith.addf %39, %40 : vector<16x1xf32>
    %42 = math.rsqrt %41 : vector<16x1xf32>
    %43 = vector.broadcast %42 : vector<16x1xf32> to vector<16x128xf32>
    %44 = arith.mulf %34, %43 : vector<16x128xf32>
    %c0_26 = arith.constant 0 : index
    %c0_27 = arith.constant 0 : index
    %45 = vector.load %arg5[%c0_26, %c0_27] : memref<1x128xf32, #tpu.memory_space<vmem>>, vector<1x128xf32>
    %46 = vector.broadcast %45 : vector<1x128xf32> to vector<16x128xf32>
    %47 = arith.mulf %44, %46 : vector<16x128xf32>
    %c0_28 = arith.constant 0 : index
    %c0_29 = arith.constant 0 : index
    %48 = vector.load %arg6[%c0_28, %c0_29] : memref<1x128xf32, #tpu.memory_space<vmem>>, vector<1x128xf32>
    %49 = vector.broadcast %48 : vector<1x128xf32> to vector<16x128xf32>
    %50 = arith.addf %47, %49 : vector<16x128xf32>
    %51 = arith.truncf %50 : vector<16x128xf32> to vector<16x128xbf16>
    %c0_30 = arith.constant 0 : index
    %c0_31 = arith.constant 0 : index
    %52 = vector.load %arg8[%c0_30, %c0_31] : memref<16x128xbf16, #tpu.memory_space<vmem>>, vector<16x128xbf16>
    tpu.vector_store %arg8[%c0_30, %c0_31], %51 {strides = array<i32>} : memref<16x128xbf16, #tpu.memory_space<vmem>>, vector<16x128xbf16>,
    return
  }
  func.func @transform_0(%arg0: i32, %arg1: memref<32xi32, #tpu.memory_space<smem>>, %arg2: memref<32xi32, #tpu.memory_space<smem>>) -> (i32, i32, i32) {
    %c0_i32 = arith.constant 0 : i32
    %c0_i32_0 = arith.constant 0 : i32
    %c0_i32_1 = arith.constant 0 : i32
    return %arg0, %c0_i32, %c0_i32_0 : i32, i32, i32
  }
  func.func @transform_1(%arg0: i32, %arg1: memref<32xi32, #tpu.memory_space<smem>>, %arg2: memref<32xi32, #tpu.memory_space<smem>>) -> (i32, i32) {
    %c0_i32 = arith.constant 0 : i32
    %c0_i32_0 = arith.constant 0 : i32
    %c0_i32_1 = arith.constant 0 : i32
    return %c0_i32, %c0_i32_0 : i32, i32
  }
  func.func @transform_2(%arg0: i32, %arg1: memref<32xi32, #tpu.memory_space<smem>>, %arg2: memref<32xi32, #tpu.memory_space<smem>>) -> (i32, i32) {
    %c0_i32 = arith.constant 0 : i32
    %c0_i32_0 = arith.constant 0 : i32
    %c0_i32_1 = arith.constant 0 : i32
    return %c0_i32, %c0_i32_0 : i32, i32
  }
  func.func @transform_3(%arg0: i32, %arg1: memref<32xi32, #tpu.memory_space<smem>>, %arg2: memref<32xi32, #tpu.memory_space<smem>>) -> (i32, i32) {
    %c0_i32 = arith.constant 0 : i32
    %c0_i32_0 = arith.constant 0 : i32
    %c0_i32_1 = arith.constant 0 : i32
    return %c0_i32, %c0_i32_0 : i32, i32
  }
  func.func @transform_5(%arg0: i32, %arg1: memref<32xi32, #tpu.memory_space<smem>>, %arg2: memref<32xi32, #tpu.memory_space<smem>>) -> (i32, i32) {
    %c0_i32 = arith.constant 0 : i32
    %c0_i32_0 = arith.constant 0 : i32
    return %arg0, %c0_i32 : i32, i32
  }
}

</mosaic_0001>

<bundles_post_ra>
// kernel: tpu_custom_call.1
= control target key start
LH: loop header
LB: loop body
LE: loop exit
PB: predicated region body
PF: predicated region fallthrough
CT: control target
= control target key end

     0   :  { %s2195_s24 = smov [#allocation6]   ;;  %s2847_s0 = inlined_call_operand.hbm [shape: s32[32], index: 0, kind: input, shape index: {}]   ;;  %s2848_s2 = inlined_call_operand.vmem [shape: s32[2,1,16], index: 2, kind: input, shape index: {}]   ;;  %s2849_s3 = inlined_call_operand.hbm [shape: f32[40,128], index: 3, kind: input, shape index: {}]   ;;  %s2850_s4 = inlined_call_operand.vmem [shape: f32[1,128], index: 4, kind: input, shape index: {}]   ;;  %s2851_s5 = inlined_call_operand.vmem [shape: f32[1,128], index: 5, kind: input, shape index: {}]   ;;  %s2852_s6 = inlined_call_operand.hbm [shape: f32[64,128], index: 6, kind: input, shape index: {}]   ;;  %s2853_s7 = inlined_call_operand.hbm [shape: bf16[32,128], index: 7, kind: output, shape index: {}]   ;;  %s2854_s1 = inlined_call_operand.vmem [shape: s32[32], index: 1, kind: input, shape index: {}]  }
   0x1   :  { %2864 = sst [smem:[#allocation63_spill]] %s2849_s3  ;;  %s14_s28 = sshll.u32 %s2854_s1, 4  ;;  %s15_s28 = int_to_ptr.vmem [resolvable:$true] %s14_s28 }
   0x2   :  { %2865 = sst [smem:[#allocation64_spill]] %s2852_s6  ;;  %s1609_s29 = scalar_lea.vmem %s15_s28, 16 }
   0x3   :  { %13 = dma.hbm_to_smem %s2847_s0, 16, %s2195_s24, [#allocation5] }
   0x4   :  { %p1610_p0 = scmp.ne.s32.totalorder %s15_s28, %s1609_s29  ;;  %p1614_p1 = scmp.lt.s32.totalorder %s15_s28, %s15_s28 }
   0x5   :  { %p1615_p2 = scmp.lt.s32.totalorder %s1609_s29, %s1609_s29 }
   0x7   :  { %p1616_p3 = por %p1615_p2, %p1614_p1 }
   0x9   :  { %p1617_p4 = pnand %p1616_p3, %p1610_p0 }
   0xb   :  { %1620 = shalt.err (!%p1617_p4)  }
   0xc   :  { %s2196_s30 = smov [#allocation7]  }
   0xd   :  { %17 = dma.vmem_to_smem %s15_s28, 16, %s2196_s30, [#allocation5] }
   0xe   :  { %2121 = dma.done.wait [#allocation5], 32 }
   0xf   :  { %2122 = vsyncadd [#allocation5], 4294967264 }
  0x10   :  { %19 = sfence }
  0x11   :  { %20 = vsyncpa [#allocation9], 0 }
  0x12   :  { %21 = vsyncpa [#allocation10], 0 }
  0x13   :  { %23 = vsyncpa [#allocation10 + $0x1], 0  ;;  %s2267_s0 = smov 0   ;;  %s2269_s8 = smov 0  }
  0x14   :  { %s2271_s1 = smov 0   ;;  %s2273_s9 = smov 0  }
  0x15 LB: > { %2866 = sst [smem:[#allocation57_spill]] %s2165_s0  ;;  %s2288_s10 = sadd.s32 4294967295, %s2177_s9   ;;  %s2177_s9 = sphi %s2273_s9, %s2902_s9   ;;  %s2173_s1 = sphi %s2271_s1, %s2904_s1   ;;  %s2169_s8 = sphi %s2269_s8, %s2906_s8   ;;  %s2165_s0 = sphi %s2267_s0, %s2905_s0  }
  0x16   : > { %2867 = sst [smem:[#allocation58_spill]] %s2173_s1  ;;  %s1251_s11 = sadd.s32 4294967294, %s2177_s9  }
  0x17   : > { %s2292_s12 = sadd.s32 1, %s2177_s9   ;;  %s125_s13 = sadd.s32 1, %s2173_s1 }
  0x18   : > { %2868 = sst [smem:[#allocation59_spill]] %s2292_s12  ;;  %s122_s14 = ssub.s32 %s2177_s9, %s2292_s12 }
  0x19   : > { %p135_p5 = scmp.ne.s32.totalorder %s2173_s1, %s2169_s8  ;;  %p123_p6 = scmp.eq.s32.totalorder %s122_s14, 0 }
  0x1a   : > { %p136_p7 = scmp.eq.s32.totalorder %s2288_s10, 1  ;;  %p141_p8 = scmp.ne.s32.totalorder %s2169_s8, %s2165_s0 }
  0x1b   : > { %p142_p9 = scmp.eq.s32.totalorder %s1251_s11, 1  ;;  %p1252_p12 = scmp.ge.s32.totalorder %s2177_s9, 1 }
  0x1c   : > { %s2303_s15 = scalar_select %p123_p6, %s2173_s1, %s125_s13  }
  0x1d   : > { %p2305_p10 = por %p136_p7, %p135_p5  ;;  %p2309_p11 = por %p142_p9, %p141_p8 }
  0x1e   : > { %2869 = sst [smem:[#allocation60_spill]] %s2303_s15  ;;  %p149_p13 = scmp.lt.s32.totalorder %s2177_s9, 3 }
  0x1f   : > { %s2870_s16 = scalar_select %p2305_p10, 1, 0 }
  0x20   : > { %s2871_s17 = scalar_select %p2309_p11, 1, 0 }
  0x21   : > { %p1483_p1 = scmp.eq.s32.totalorder %s2288_s10, 0  ;;  %p2317_p2 = pnand %p1252_p12, %p149_p13 }
  0x22   : > { %2872 = sst [smem:[#allocation61_spill]] %s2871_s17  ;;  %s2197_s19 = smov [#allocation8]  }
  0x23   : > { %s161_s20 = sshll.u32 %s2197_s19, 4  ;;  %p1475_p3 = pneg %p2317_p2  ;;  %s162_s20 = int_to_ptr.vmem [resolvable:$true] %s161_s20 }
  0x24   : > { %s1632_s21 = scalar_lea.vmem %s162_s20, 640  ;;  %p1640_p9 = scmp.lt.s32.totalorder %s162_s20, %s162_s20 }
  0x25   : > { %p1476_p4 = pnand %p1483_p1, %p1475_p3  ;;  %p1633_p6 = scmp.ne.s32.totalorder %s162_s20, %s1632_s21 }
  0x26   : > { %p1641_p0 = scmp.lt.s32.totalorder %s1632_s21, %s1632_s21 }
  0x27   : > { %p1623_p5 = pneg %p1476_p4 }
  0x28   : > { %p1642_p11 = por %p1641_p0, %p1640_p9 }
  0x29   : > { %p1635_p7 = pnand %p1633_p6, %p1623_p5 }
  0x2b   : > { %p1636_p8 = pneg %p1635_p7 }
  0x2d   : > { %p1643_p12 = pnand %p1642_p11, %p1636_p8 }
  0x2f   : > { %1646 = shalt.err (!%p1643_p12)
}
  0x30   : > { %s2198_s22 = smov 128   ;;  %s2199_s23 = smov 8  }
  0x31   : > { %s2874_s3 = sld [smem:[#allocation63_spill]] }
  0x33   : > { %189 = sbr.rel (%p2317_p2) target bundleno = 1153 (0x481), region = 36 }
  0x37   : > { %1478 = dma.hbm_to_vmem [thread:$0]  (!%p1476_p4), %s2874_s3, 640, %s162_s20, [#allocation9], %s2198_s22, %s2198_s22, %s2199_s23  }
  0x38   : > { %2124 = dma.done.wait (%p1483_p1), [#allocation9], 640  }
  0x39   : > { %2126 = vsyncadd (%p1483_p1), [#allocation9], 4294966656  ;;  %s2855_s25 = sand.u32 1, %s2169_s8   ;;  %p2875_p11 = scmp.ne.s32.totalorder %s2288_s10, 0 }
  0x3a   : > { %s2337_s26 = sshll.u32 %s2855_s25, 3  ;;  %s2342_s28 = smov (!%p2875_p11), 0  }
  0x3b   : > { %220 = sbr.rel (%p2875_p11) target bundleno = 368 (0x170), region = 44 }
  0x40 LB: >> { %s2348_s29 = sshll.u32 %s2181_s28, 3  ;;  %s2876_s6 = sld [smem:[#allocation64_spill]]  ;;  %s2181_s28 = sphi %s2342_s28, %s226_s28  }
  0x41   : >> { %s2351_s30 = sld [smem:[#allocation6 + %s2348_s29]]  ;;  %s2354_s11 = scalar_lea.vmem [#allocation2], %s2348_s29 }
  0x42   : >> { %s243_s13 = sshll.u32 %s2354_s11, 4  ;;  %s244_s13 = int_to_ptr.vmem [resolvable:$true] %s243_s13 }
  0x46   : >> { %s2367_s24 = scalar_lea.hbm %s2876_s6, 1024 }
  0x47   : >> { %p1485_p13 = scmp.ne.s32.totalorder %s2351_s30, 1  ;;  %s1261_s14 = sshll.u32 %s2351_s30, 4 }
  0x48   : >> { %s234_s20 = scalar_lea.hbm %s2876_s6, %s1261_s14 }
  0x49   : >> { %s1647_s21 = scalar_lea.hbm %s234_s20, 16  ;;  %p1652_p3 = scmp.lt.s32.totalorder %s234_s20, %s2876_s6 }
  0x4a   : >> { %p1648_p0 = scmp.ne.s32.totalorder %s234_s20, %s1647_s21  ;;  %p1653_p4 = scmp.lt.s32.totalorder %s2367_s24, %s1647_s21 }
  0x4c   : >> { %p1649_p1 = pnand %p1648_p0, %p1485_p13  ;;  %p1654_p5 = por %p1653_p4, %p1652_p3 }
  0x4e   : >> { %p1650_p2 = pneg %p1649_p1 }
  0x50   : >> { %p1655_p6 = pnand %p1654_p5, %p1650_p2 }
  0x52   : >> { %1658 = shalt.err (!%p1655_p6)  }
  0x53   : >> { %s1659_s14 = scalar_lea.vmem %s244_s13, 16  ;;  %s2200_s18 = smov [#allocation2]  }
  0x54   : >> { %p1660_p7 = scmp.ne.s32.totalorder %s244_s13, %s1659_s14  ;;  %s1663_s19 = sshll.u32 %s2200_s18, 4  ;;  %s2375_s19 = int_to_ptr.vmem [resolvable:$false] %s1663_s19 }
  0x55   : >> { %s2378_s22 = scalar_lea.vmem %s2375_s19, 512  ;;  %p1666_p12 = scmp.lt.s32.totalorder %s244_s13, %s2375_s19 }
  0x56   : >> { %p1661_p8 = pnand %p1660_p7, %p1485_p13  ;;  %p1667_p11 = scmp.lt.s32.totalorder %s2378_s22, %s1659_s14 }
  0x58   : >> { %p1662_p9 = pneg %p1661_p8  ;;  %p1668_p0 = por %p1667_p11, %p1666_p12 }
  0x5a   : >> { %p1669_p1 = pnand %p1668_p0, %p1662_p9 }
  0x5c   : >> { %1672 = shalt.err (!%p1669_p1)  }
  0x5d   : >> { %1426 = dma.hbm_to_vmem [thread:$0]  (%p1485_p13), %s234_s20, 16, %s244_s13, [#allocation4] }
  0x5e   : >> { %250 = sbr.rel (%p1485_p13) target bundleno = 101 (0x65), region = 63 }
  0x63   : >> { %v2201_v0 = vmov 0.0  }
  0x64   : >> { %252 = vst [vmem:[%s2354_s11] sm:$0x1] %v2201_v0 }
  0x65 PF: >> { %s253_s25 = sadd.s32 1, %s2348_s29  ;;  %s998_s21 = scalar_lea.vmem %s2354_s11, 1 [#allocation2] }
  0x66   : >> { %s254_s23 = sld [smem:[#allocation6 + %s253_s25]]  ;;  %s269_s2 = sshll.u32 %s998_s21, 4  ;;  %s270_s2 = int_to_ptr.vmem [resolvable:$true] %s269_s2 }
  0x67   : >> { %s2877_s6 = sld [smem:[#allocation64_spill]] }
  0x6c   : >> { %p1486_p2 = scmp.ne.s32.totalorder %s254_s23, 1  ;;  %s1264_s14 = sshll.u32 %s254_s23, 4 }
  0x6d   : >> { %s260_s13 = scalar_lea.hbm %s2877_s6, %s1264_s14 }
  0x6e   : >> { %s1673_s30 = scalar_lea.hbm %s260_s13, 16  ;;  %p1678_p5 = scmp.lt.s32.totalorder %s260_s13, %s2877_s6 }
  0x6f   : >> { %p1674_p13 = scmp.ne.s32.totalorder %s260_s13, %s1673_s30  ;;  %p1679_p6 = scmp.lt.s32.totalorder %s2367_s24, %s1673_s30 }
  0x71   : >> { %p1675_p3 = pnand %p1674_p13, %p1486_p2  ;;  %p1680_p7 = por %p1679_p6, %p1678_p5 }
  0x73   : >> { %p1676_p4 = pneg %p1675_p3 }
  0x75   : >> { %p1681_p8 = pnand %p1680_p7, %p1676_p4 }
  0x77   : >> { %1684 = shalt.err (!%p1681_p8)  }
  0x78   : >> { %s1685_s25 = scalar_lea.vmem %s270_s2, 16  ;;  %p1692_p0 = scmp.lt.s32.totalorder %s270_s2, %s2375_s19 }
  0x79   : >> { %p1686_p9 = scmp.ne.s32.totalorder %s270_s2, %s1685_s25  ;;  %p1693_p1 = scmp.lt.s32.totalorder %s2378_s22, %s1685_s25 }
  0x7b   : >> { %p1687_p12 = pnand %p1686_p9, %p1486_p2  ;;  %p1694_p10 = por %p1693_p1, %p1692_p0 }
  0x7d   : >> { %p1688_p11 = pneg %p1687_p12 }
  0x7f   : >> { %p1695_p13 = pnand %p1694_p10, %p1688_p11 }
  0x81   : >> { %1698 = shalt.err (!%p1695_p13)  }
  0x82   : >> { %1428 = dma.hbm_to_vmem [thread:$0]  (%p1486_p2), %s260_s13, 16, %s270_s2, [#allocation4] }
  0x83   : >> { %276 = sbr.rel (%p1486_p2) target bundleno = 138 (0x8a), region = 75 }
  0x88   : >> { %v2202_v1 = vmov 0.0  }
  0x89   : >> { %1268 = vst [vmem:[%s2354_s11 + $0x1] sm:$0x1] %v2202_v1 }
  0x8a PF: >> { %s279_s3 = sadd.s32 2, %s2348_s29  ;;  %s1006_s27 = scalar_lea.vmem %s2354_s11, 2 [#allocation2] }
  0x8b   : >> { %s280_s21 = sld [smem:[#allocation6 + %s279_s3]]  ;;  %s295_s14 = sshll.u32 %s1006_s27, 4  ;;  %s296_s14 = int_to_ptr.vmem [resolvable:$true] %s295_s14 }
  0x8c   : >> { %s2878_s6 = sld [smem:[#allocation64_spill]] }
  0x91   : >> { %p1487_p3 = scmp.ne.s32.totalorder %s280_s21, 1  ;;  %s1270_s18 = sshll.u32 %s280_s21, 4 }
  0x92   : >> { %s286_s2 = scalar_lea.hbm %s2878_s6, %s1270_s18 }
  0x93   : >> { %s1699_s23 = scalar_lea.hbm %s286_s2, 16  ;;  %p1704_p5 = scmp.lt.s32.totalorder %s286_s2, %s2878_s6 }
  0x94   : >> { %p1700_p10 = scmp.ne.s32.totalorder %s286_s2, %s1699_s23  ;;  %p1705_p6 = scmp.lt.s32.totalorder %s2367_s24, %s1699_s23 }
  0x96   : >> { %p1701_p2 = pnand %p1700_p10, %p1487_p3  ;;  %p1706_p7 = por %p1705_p6, %p1704_p5 }
  0x98   : >> { %p1702_p4 = pneg %p1701_p2 }
  0x9a   : >> { %p1707_p8 = pnand %p1706_p7, %p1702_p4 }
  0x9c   : >> { %1710 = shalt.err (!%p1707_p8)  }
  0x9d   : >> { %s1711_s3 = scalar_lea.vmem %s296_s14, 16  ;;  %p1718_p0 = scmp.lt.s32.totalorder %s296_s14, %s2375_s19 }
  0x9e   : >> { %p1712_p9 = scmp.ne.s32.totalorder %s296_s14, %s1711_s3  ;;  %p1719_p1 = scmp.lt.s32.totalorder %s2378_s22, %s1711_s3 }
  0xa0   : >> { %p1713_p12 = pnand %p1712_p9, %p1487_p3  ;;  %p1720_p13 = por %p1719_p1, %p1718_p0 }
  0xa2   : >> { %p1714_p11 = pneg %p1713_p12 }
  0xa4   : >> { %p1721_p10 = pnand %p1720_p13, %p1714_p11 }
  0xa6   : >> { %1724 = shalt.err (!%p1721_p10)  }
  0xa7   : >> { %1430 = dma.hbm_to_vmem [thread:$0]  (%p1487_p3), %s286_s2, 16, %s296_s14, [#allocation4] }
  0xa8   : >> { %302 = sbr.rel (%p1487_p3) target bundleno = 175 (0xaf), region = 87 }
  0xad   : >> { %v2203_v2 = vmov 0.0  }
  0xae   : >> { %1274 = vst [vmem:[%s2354_s11 + $0x2] sm:$0x1] %v2203_v2 }
  0xaf PF: >> { %s305_s27 = sadd.s32 3, %s2348_s29  ;;  %s1014_s18 = scalar_lea.vmem %s2354_s11, 3 [#allocation2] }
  0xb0   : >> { %s306_s30 = sld [smem:[#allocation6 + %s305_s27]]  ;;  %s321_s20 = sshll.u32 %s1014_s18, 4  ;;  %s322_s20 = int_to_ptr.vmem [resolvable:$true] %s321_s20 }
  0xb1   : >> { %s2879_s6 = sld [smem:[#allocation64_spill]] }
  0xb6   : >> { %p1488_p2 = scmp.ne.s32.totalorder %s306_s30, 1  ;;  %s1276_s23 = sshll.u32 %s306_s30, 4 }
  0xb7   : >> { %s312_s14 = scalar_lea.hbm %s2879_s6, %s1276_s23 }
  0xb8   : >> { %s1725_s21 = scalar_lea.hbm %s312_s14, 16  ;;  %p1730_p6 = scmp.lt.s32.totalorder %s312_s14, %s2879_s6 }
  0xb9   : >> { %p1726_p3 = scmp.ne.s32.totalorder %s312_s14, %s1725_s21  ;;  %p1731_p7 = scmp.lt.s32.totalorder %s2367_s24, %s1725_s21 }
  0xbb   : >> { %p1727_p4 = pnand %p1726_p3, %p1488_p2  ;;  %p1732_p8 = por %p1731_p7, %p1730_p6 }
  0xbd   : >> { %p1728_p5 = pneg %p1727_p4 }
  0xbf   : >> { %p1733_p9 = pnand %p1732_p8, %p1728_p5 }
  0xc1   : >> { %1736 = shalt.err (!%p1733_p9)  }
  0xc2   : >> { %s1737_s27 = scalar_lea.vmem %s322_s20, 16  ;;  %p1744_p1 = scmp.lt.s32.totalorder %s322_s20, %s2375_s19 }
  0xc3   : >> { %p1738_p12 = scmp.ne.s32.totalorder %s322_s20, %s1737_s27  ;;  %p1745_p13 = scmp.lt.s32.totalorder %s2378_s22, %s1737_s27 }
  0xc5   : >> { %p1739_p11 = pnand %p1738_p12, %p1488_p2  ;;  %p1746_p10 = por %p1745_p13, %p1744_p1 }
  0xc7   : >> { %p1740_p0 = pneg %p1739_p11 }
  0xc9   : >> { %p1747_p3 = pnand %p1746_p10, %p1740_p0 }
  0xcb   : >> { %1750 = shalt.err (!%p1747_p3)  }
  0xcc   : >> { %1432 = dma.hbm_to_vmem [thread:$0]  (%p1488_p2), %s312_s14, 16, %s322_s20, [#allocation4] }
  0xcd   : >> { %328 = sbr.rel (%p1488_p2) target bundleno = 212 (0xd4), region = 99 }
  0xd2   : >> { %v2204_v3 = vmov 0.0  }
  0xd3   : >> { %1280 = vst [vmem:[%s2354_s11 + $0x3] sm:$0x1] %v2204_v3 }
  0xd4 PF: >> { %s331_s18 = sadd.s32 4, %s2348_s29  ;;  %s1022_s23 = scalar_lea.vmem %s2354_s11, 4 [#allocation2] }
  0xd5   : >> { %s332_s13 = sld [smem:[#allocation6 + %s331_s18]]  ;;  %s347_s25 = sshll.u32 %s1022_s23, 4  ;;  %s348_s25 = int_to_ptr.vmem [resolvable:$true] %s347_s25 }
  0xd6   : >> { %s2880_s6 = sld [smem:[#allocation64_spill]] }
  0xdb   : >> { %p1489_p4 = scmp.ne.s32.totalorder %s332_s13, 1  ;;  %s1282_s21 = sshll.u32 %s332_s13, 4 }
  0xdc   : >> { %s338_s20 = scalar_lea.hbm %s2880_s6, %s1282_s21 }
  0xdd   : >> { %s1751_s30 = scalar_lea.hbm %s338_s20, 16  ;;  %p1756_p7 = scmp.lt.s32.totalorder %s338_s20, %s2880_s6 }
  0xde   : >> { %p1752_p2 = scmp.ne.s32.totalorder %s338_s20, %s1751_s30  ;;  %p1757_p8 = scmp.lt.s32.totalorder %s2367_s24, %s1751_s30 }
  0xe0   : >> { %p1753_p5 = pnand %p1752_p2, %p1489_p4  ;;  %p1758_p9 = por %p1757_p8, %p1756_p7 }
  0xe2   : >> { %p1754_p6 = pneg %p1753_p5 }
  0xe4   : >> { %p1759_p12 = pnand %p1758_p9, %p1754_p6 }
  0xe6   : >> { %1762 = shalt.err (!%p1759_p12)  }
  0xe7   : >> { %s1763_s18 = scalar_lea.vmem %s348_s25, 16  ;;  %p1770_p13 = scmp.lt.s32.totalorder %s348_s25, %s2375_s19 }
  0xe8   : >> { %p1764_p11 = scmp.ne.s32.totalorder %s348_s25, %s1763_s18  ;;  %p1771_p10 = scmp.lt.s32.totalorder %s2378_s22, %s1763_s18 }
  0xea   : >> { %p1765_p0 = pnand %p1764_p11, %p1489_p4  ;;  %p1772_p3 = por %p1771_p10, %p1770_p13 }
  0xec   : >> { %p1766_p1 = pneg %p1765_p0 }
  0xee   : >> { %p1773_p2 = pnand %p1772_p3, %p1766_p1 }
  0xf0   : >> { %1776 = shalt.err (!%p1773_p2)  }
  0xf1   : >> { %1434 = dma.hbm_to_vmem [thread:$0]  (%p1489_p4), %s338_s20, 16, %s348_s25, [#allocation4] }
  0xf2   : >> { %354 = sbr.rel (%p1489_p4) target bundleno = 249 (0xf9), region = 111 }
  0xf7   : >> { %v2205_v4 = vmov 0.0  }
  0xf8   : >> { %1286 = vst [vmem:[%s2354_s11 + $0x4] sm:$0x1] %v2205_v4 }
  0xf9 PF: >> { %s357_s23 = sadd.s32 5, %s2348_s29  ;;  %s1030_s21 = scalar_lea.vmem %s2354_s11, 5 [#allocation2] }
  0xfa   : >> { %s358_s2 = sld [smem:[#allocation6 + %s357_s23]]  ;;  %s373_s3 = sshll.u32 %s1030_s21, 4  ;;  %s374_s3 = int_to_ptr.vmem [resolvable:$true] %s373_s3 }
  0xfb   : >> { %s2881_s6 = sld [smem:[#allocation64_spill]] }
 0x100   : >> { %p1490_p5 = scmp.ne.s32.totalorder %s358_s2, 1  ;;  %s1288_s30 = sshll.u32 %s358_s2, 4 }
 0x101   : >> { %s364_s25 = scalar_lea.hbm %s2881_s6, %s1288_s30 }
 0x102   : >> { %s1777_s13 = scalar_lea.hbm %s364_s25, 16  ;;  %p1782_p8 = scmp.lt.s32.totalorder %s364_s25, %s2881_s6 }
 0x103   : >> { %p1778_p4 = scmp.ne.s32.totalorder %s364_s25, %s1777_s13  ;;  %p1783_p9 = scmp.lt.s32.totalorder %s2367_s24, %s1777_s13 }
 0x105   : >> { %p1779_p6 = pnand %p1778_p4, %p1490_p5  ;;  %p1784_p12 = por %p1783_p9, %p1782_p8 }
 0x107   : >> { %p1780_p7 = pneg %p1779_p6 }
 0x109   : >> { %p1785_p11 = pnand %p1784_p12, %p1780_p7 }
 0x10b   : >> { %1788 = shalt.err (!%p1785_p11)  }
 0x10c   : >> { %s1789_s23 = scalar_lea.vmem %s374_s3, 16  ;;  %p1796_p10 = scmp.lt.s32.totalorder %s374_s3, %s2375_s19 }
 0x10d   : >> { %p1790_p0 = scmp.ne.s32.totalorder %s374_s3, %s1789_s23  ;;  %p1797_p3 = scmp.lt.s32.totalorder %s2378_s22, %s1789_s23 }
 0x10f   : >> { %p1791_p1 = pnand %p1790_p0, %p1490_p5  ;;  %p1798_p2 = por %p1797_p3, %p1796_p10 }
 0x111   : >> { %p1792_p13 = pneg %p1791_p1 }
 0x113   : >> { %p1799_p4 = pnand %p1798_p2, %p1792_p13 }
 0x115   : >> { %1802 = shalt.err (!%p1799_p4)  }
 0x116   : >> { %1436 = dma.hbm_to_vmem [thread:$0]  (%p1490_p5), %s364_s25, 16, %s374_s3, [#allocation4] }
 0x117   : >> { %380 = sbr.rel (%p1490_p5) target bundleno = 286 (0x11e), region = 123 }
 0x11c   : >> { %v2206_v5 = vmov 0.0  }
 0x11d   : >> { %1292 = vst [vmem:[%s2354_s11 + $0x5] sm:$0x1] %v2206_v5 }
 0x11e PF: >> { %s383_s21 = sadd.s32 6, %s2348_s29  ;;  %s1038_s30 = scalar_lea.vmem %s2354_s11, 6 [#allocation2] }
 0x11f   : >> { %s384_s14 = sld [smem:[#allocation6 + %s383_s21]]  ;;  %s399_s27 = sshll.u32 %s1038_s30, 4  ;;  %s400_s27 = int_to_ptr.vmem [resolvable:$true] %s399_s27 }
 0x120   : >> { %s2882_s6 = sld [smem:[#allocation64_spill]] }
 0x125   : >> { %p1491_p6 = scmp.ne.s32.totalorder %s384_s14, 1  ;;  %s1294_s13 = sshll.u32 %s384_s14, 4 }
 0x126   : >> { %s390_s3 = scalar_lea.hbm %s2882_s6, %s1294_s13 }
 0x127   : >> { %s1803_s2 = scalar_lea.hbm %s390_s3, 16  ;;  %p1808_p9 = scmp.lt.s32.totalorder %s390_s3, %s2882_s6 }
 0x128   : >> { %p1804_p5 = scmp.ne.s32.totalorder %s390_s3, %s1803_s2  ;;  %p1809_p12 = scmp.lt.s32.totalorder %s2367_s24, %s1803_s2 }
 0x12a   : >> { %p1805_p7 = pnand %p1804_p5, %p1491_p6  ;;  %p1810_p11 = por %p1809_p12, %p1808_p9 }
 0x12c   : >> { %p1806_p8 = pneg %p1805_p7 }
 0x12e   : >> { %p1811_p0 = pnand %p1810_p11, %p1806_p8 }
 0x130   : >> { %1814 = shalt.err (!%p1811_p0)  }
 0x131   : >> { %s1815_s21 = scalar_lea.vmem %s400_s27, 16  ;;  %p1822_p3 = scmp.lt.s32.totalorder %s400_s27, %s2375_s19 }
 0x132   : >> { %p1816_p1 = scmp.ne.s32.totalorder %s400_s27, %s1815_s21  ;;  %p1823_p2 = scmp.lt.s32.totalorder %s2378_s22, %s1815_s21 }
 0x134   : >> { %p1817_p13 = pnand %p1816_p1, %p1491_p6  ;;  %p1824_p4 = por %p1823_p2, %p1822_p3 }
 0x136   : >> { %p1818_p10 = pneg %p1817_p13 }
 0x138   : >> { %p1825_p5 = pnand %p1824_p4, %p1818_p10 }
 0x13a   : >> { %1828 = shalt.err (!%p1825_p5)  }
 0x13b   : >> { %1438 = dma.hbm_to_vmem [thread:$0]  (%p1491_p6), %s390_s3, 16, %s400_s27, [#allocation4] }
 0x13c   : >> { %406 = sbr.rel (%p1491_p6) target bundleno = 323 (0x143), region = 135 }
 0x141   : >> { %v2207_v6 = vmov 0.0  }
 0x142   : >> { %1298 = vst [vmem:[%s2354_s11 + $0x6] sm:$0x1] %v2207_v6 }
 0x143 PF: >> { %s409_s30 = sadd.s32 7, %s2348_s29  ;;  %s1046_s13 = scalar_lea.vmem %s2354_s11, 7 [#allocation2] }
 0x144   : >> { %s410_s20 = sld [smem:[#allocation6 + %s409_s30]]  ;;  %s425_s18 = sshll.u32 %s1046_s13, 4  ;;  %s426_s18 = int_to_ptr.vmem [resolvable:$true] %s425_s18 }
 0x145   : >> { %s2883_s6 = sld [smem:[#allocation64_spill]] }
 0x14a   : >> { %p1492_p7 = scmp.ne.s32.totalorder %s410_s20, 1  ;;  %s1300_s2 = sshll.u32 %s410_s20, 4 }
 0x14b   : >> { %s416_s27 = scalar_lea.hbm %s2883_s6, %s1300_s2 }
 0x14c   : >> { %s1829_s14 = scalar_lea.hbm %s416_s27, 16  ;;  %p1834_p12 = scmp.lt.s32.totalorder %s416_s27, %s2883_s6 }
 0x14d   : >> { %p1830_p6 = scmp.ne.s32.totalorder %s416_s27, %s1829_s14  ;;  %p1835_p11 = scmp.lt.s32.totalorder %s2367_s24, %s1829_s14 }
 0x14f   : >> { %p1831_p8 = pnand %p1830_p6, %p1492_p7  ;;  %p1836_p0 = por %p1835_p11, %p1834_p12 }
 0x151   : >> { %p1832_p9 = pneg %p1831_p8 }
 0x153   : >> { %p1837_p1 = pnand %p1836_p0, %p1832_p9 }
 0x155   : >> { %1840 = shalt.err (!%p1837_p1)  }
 0x156   : >> { %s1841_s29 = scalar_lea.vmem %s426_s18, 16  ;;  %p1848_p2 = scmp.lt.s32.totalorder %s426_s18, %s2375_s19 }
 0x157   : >> { %p1842_p13 = scmp.ne.s32.totalorder %s426_s18, %s1841_s29  ;;  %p1849_p4 = scmp.lt.s32.totalorder %s2378_s22, %s1841_s29 }
 0x159   : >> { %p1843_p10 = pnand %p1842_p13, %p1492_p7  ;;  %p1850_p5 = por %p1849_p4, %p1848_p2 }
 0x15b   : >> { %p1844_p3 = pneg %p1843_p10 }
 0x15d   : >> { %p1851_p6 = pnand %p1850_p5, %p1844_p3 }
 0x15f   : >> { %1854 = shalt.err (!%p1851_p6)  }
 0x160   : >> { %1440 = dma.hbm_to_vmem [thread:$0]  (%p1492_p7), %s416_s27, 16, %s426_s18, [#allocation4] }
 0x161   : >> { %432 = sbr.rel (%p1492_p7) target bundleno = 360 (0x168), region = 147 }
 0x166   : >> { %v2208_v7 = vmov 0.0  }
 0x167   : >> { %1304 = vst [vmem:[%s2354_s11 + $0x7] sm:$0x1] %v2208_v7 }
 0x168 PF: >> { %s226_s28 = sadd.s32 1, %s2181_s28  }
 0x169   : >> { %p223_p8 = scmp.ge.s32.totalorder %s226_s28, 2  }
 0x16b   : > { %225 = sbr.rel (!%p223_p8) target bundleno = 64 (0x40), region = 418 }
 0x170 PF: > { %s435_s24 = sadd.s32 1, %s2288_s10 }
 0x171   : > { %p1305_p9 = scmp.ge.s32.totalorder %s435_s24, 2 }
 0x172   : > { %p440_p12 = scmp.lt.s32.totalorder (!%p1305_p9), %s435_s24, 0  ;;  %s441_s19 = ssub.s32 (!%p1305_p9), 0, %s435_s24 }
 0x173   : > { %439 = sbr.rel (%p1305_p9) target bundleno = 694 (0x2b6), region = 151  ;;  %s1306_s22 = smin.u32 (!%p1305_p9), %s441_s19, %s435_s24 }
 0x174   : > { %s1411_s30 = sshll.u32 (!%p1305_p9), %s2288_s10, 4  ;;  %s443_s13 = sand.u32 (!%p1305_p9), 1, %s1306_s22  }
 0x175   : > { %s2504_s20 = sadd.s32 (!%p1305_p9), 16, %s1411_s30  ;;  %s444_s11 = ssub.s32 (!%p1305_p9), 0, %s443_s13 }
 0x176   : > { %s2509_s2 = smov (!%p1305_p9), 0  }
 0x178   : > { %s2908_s11 = smov (!%p440_p12, %s444_s11), %s443_s13 }
 0x179   : > { %p1308_p7 = scmp.lt.s32.totalorder %s2908_s11, 0  ;;  %s450_s18 = sadd.s32 2, %s2908_s11 }
 0x17b   : > { %s2910_s18 = smov (!%p1308_p7, %s450_s18), %s2908_s11 }
 0x17c   : > { %2884 = sst [smem:[#allocation62_spill]] %s2910_s18 }
 0x17d LB: >> { %s2885_s18 = sld [smem:[#allocation62_spill]]  ;;  %s2515_s25 = sshll.u32 %s2185_s2, 3  ;;  %s2185_s2 = sphi %s2509_s2, %s459_s2  }
 0x17e   : >> { %s461_s23 = sadd.s32 %s2504_s20, %s2515_s25  ;;  %s2887_s6 = sld [smem:[#allocation64_spill]] }
 0x17f   : >> { %s2522_s14 = sld [smem:[#allocation6 + %s461_s23]] }
 0x183   : >> { %s2886_s28 = sshll.u32 %s2885_s18, 4  ;;  %s2535_s30 = scalar_lea.sflag [#allocation4], %s2885_s18 }
 0x184   : >> { %s467_s27 = sadd.s32 %s2515_s25, %s2886_s28 }
 0x185   : >> { %s2524_s3 = scalar_lea.vmem [#allocation2], %s467_s27  ;;  %p1493_p11 = scmp.ne.s32.totalorder %s2522_s14, 1 }
 0x186   : >> { %s479_s21 = sshll.u32 %s2524_s3, 4  ;;  %s1313_s29 = sshll.u32 %s2522_s14, 4  ;;  %s2527_s21 = int_to_ptr.vmem [resolvable:$true] %s479_s21 }
 0x187   : >> { %s469_s22 = scalar_lea.hbm %s2887_s6, %s1313_s29  ;;  %s2542_s27 = scalar_lea.hbm %s2887_s6, 1024 }
 0x188   : >> { %s1855_s13 = scalar_lea.hbm %s469_s22, 16  ;;  %p1860_p10 = scmp.lt.s32.totalorder %s469_s22, %s2887_s6 }
 0x189   : >> { %p1856_p0 = scmp.ne.s32.totalorder %s469_s22, %s1855_s13  ;;  %p1861_p3 = scmp.lt.s32.totalorder %s2542_s27, %s1855_s13 }
 0x18b   : >> { %p1857_p1 = pnand %p1856_p0, %p1493_p11  ;;  %p1862_p2 = por %p1861_p3, %p1860_p10 }
 0x18d   : >> { %p1858_p13 = pneg %p1857_p1 }
 0x18f   : >> { %p1863_p4 = pnand %p1862_p2, %p1858_p13 }
 0x191   : >> { %1866 = shalt.err (!%p1863_p4)  }
 0x192   : >> { %s1867_s29 = scalar_lea.vmem %s2527_s21, 16  ;;  %s2209_s24 = smov [#allocation2]  }
 0x193   : >> { %p1868_p5 = scmp.ne.s32.totalorder %s2527_s21, %s1867_s29  ;;  %s1871_s19 = sshll.u32 %s2209_s24, 4  ;;  %s2552_s19 = int_to_ptr.vmem [resolvable:$false] %s1871_s19 }
 0x194   : >> { %s2555_s15 = scalar_lea.vmem %s2552_s19, 512  ;;  %p1874_p9 = scmp.lt.s32.totalorder %s2527_s21, %s2552_s19 }
 0x195   : >> { %p1869_p6 = pnand %p1868_p5, %p1493_p11  ;;  %p1875_p12 = scmp.lt.s32.totalorder %s2555_s15, %s1867_s29 }
 0x197   : >> { %p1870_p8 = pneg %p1869_p6  ;;  %p1876_p7 = por %p1875_p12, %p1874_p9 }
 0x199   : >> { %p1877_p0 = pnand %p1876_p7, %p1870_p8 }
 0x19b   : >> { %1880 = shalt.err (!%p1877_p0)  }
 0x19c   : >> { %1442 = dma.hbm_to_vmem [thread:$0]  (%p1493_p11), %s469_s22, 16, %s2527_s21, %s2535_s30 }
 0x19d   : >> { %486 = sbr.rel (%p1493_p11) target bundleno = 420 (0x1a4), region = 170 }
 0x1a2   : >> { %v2210_v8 = vmov 0.0  }
 0x1a3   : >> { %489 = vst [vmem:[%s2524_s3] sm:$0x1] %v2210_v8 }
 0x1a4 PF: >> { %s490_s28 = sadd.s32 1, %s2515_s25  ;;  %s1067_s11 = scalar_lea.vmem %s2524_s3, 1 [#allocation2] }
 0x1a5   : >> { %s491_s13 = sadd.s32 %s2504_s20, %s490_s28  ;;  %s509_s29 = sshll.u32 %s1067_s11, 4  ;;  %s510_s29 = int_to_ptr.vmem [resolvable:$true] %s509_s29 }
 0x1a6   : >> { %s492_s23 = sld [smem:[#allocation6 + %s491_s13]] }
 0x1a7   : >> { %s2888_s6 = sld [smem:[#allocation64_spill]] }
 0x1ac   : >> { %p1494_p1 = scmp.ne.s32.totalorder %s492_s23, 1  ;;  %s1316_s24 = sshll.u32 %s492_s23, 4 }
 0x1ad   : >> { %s499_s14 = scalar_lea.hbm %s2888_s6, %s1316_s24 }
 0x1ae   : >> { %s1881_s18 = scalar_lea.hbm %s499_s14, 16  ;;  %p1886_p3 = scmp.lt.s32.totalorder %s499_s14, %s2888_s6 }
 0x1af   : >> { %p1882_p11 = scmp.ne.s32.totalorder %s499_s14, %s1881_s18  ;;  %p1887_p2 = scmp.lt.s32.totalorder %s2542_s27, %s1881_s18 }
 0x1b1   : >> { %p1883_p13 = pnand %p1882_p11, %p1494_p1  ;;  %p1888_p4 = por %p1887_p2, %p1886_p3 }
 0x1b3   : >> { %p1884_p10 = pneg %p1883_p13 }
 0x1b5   : >> { %p1889_p5 = pnand %p1888_p4, %p1884_p10 }
 0x1b7   : >> { %1892 = shalt.err (!%p1889_p5)  }
 0x1b8   : >> { %s1893_s28 = scalar_lea.vmem %s510_s29, 16  ;;  %p1900_p12 = scmp.lt.s32.totalorder %s510_s29, %s2552_s19 }
 0x1b9   : >> { %p1894_p6 = scmp.ne.s32.totalorder %s510_s29, %s1893_s28  ;;  %p1901_p7 = scmp.lt.s32.totalorder %s2555_s15, %s1893_s28 }
 0x1bb   : >> { %p1895_p8 = pnand %p1894_p6, %p1494_p1  ;;  %p1902_p0 = por %p1901_p7, %p1900_p12 }
 0x1bd   : >> { %p1896_p9 = pneg %p1895_p8 }
 0x1bf   : >> { %p1903_p11 = pnand %p1902_p0, %p1896_p9 }
 0x1c1   : >> { %1906 = shalt.err (!%p1903_p11)  }
 0x1c2   : >> { %1444 = dma.hbm_to_vmem [thread:$0]  (%p1494_p1), %s499_s14, 16, %s510_s29, %s2535_s30 }
 0x1c3   : >> { %516 = sbr.rel (%p1494_p1) target bundleno = 458 (0x1ca), region = 182 }
 0x1c8   : >> { %v2211_v9 = vmov 0.0  }
 0x1c9   : >> { %1322 = vst [vmem:[%s2524_s3 + $0x1] sm:$0x1] %v2211_v9 }
 0x1ca PF: >> { %s520_s1 = sadd.s32 2, %s2515_s25  ;;  %s1080_s18 = scalar_lea.vmem %s2524_s3, 2 [#allocation2] }
 0x1cb   : >> { %s521_s12 = sadd.s32 %s2504_s20, %s520_s1  ;;  %s539_s11 = sshll.u32 %s1080_s18, 4  ;;  %s540_s11 = int_to_ptr.vmem [resolvable:$true] %s539_s11 }
 0x1cc   : >> { %s522_s13 = sld [smem:[#allocation6 + %s521_s12]] }
 0x1cd   : >> { %s2889_s6 = sld [smem:[#allocation64_spill]] }
 0x1d2   : >> { %p1495_p13 = scmp.ne.s32.totalorder %s522_s13, 1  ;;  %s1324_s24 = sshll.u32 %s522_s13, 4 }
 0x1d3   : >> { %s529_s23 = scalar_lea.hbm %s2889_s6, %s1324_s24 }
 0x1d4   : >> { %s1907_s22 = scalar_lea.hbm %s529_s23, 16  ;;  %p1912_p2 = scmp.lt.s32.totalorder %s529_s23, %s2889_s6 }
 0x1d5   : >> { %p1908_p1 = scmp.ne.s32.totalorder %s529_s23, %s1907_s22  ;;  %p1913_p4 = scmp.lt.s32.totalorder %s2542_s27, %s1907_s22 }
 0x1d7   : >> { %p1909_p10 = pnand %p1908_p1, %p1495_p13  ;;  %p1914_p5 = por %p1913_p4, %p1912_p2 }
 0x1d9   : >> { %p1910_p3 = pneg %p1909_p10 }
 0x1db   : >> { %p1915_p6 = pnand %p1914_p5, %p1910_p3 }
 0x1dd   : >> { %1918 = shalt.err (!%p1915_p6)  }
 0x1de   : >> { %s1919_s1 = scalar_lea.vmem %s540_s11, 16  ;;  %p1926_p7 = scmp.lt.s32.totalorder %s540_s11, %s2552_s19 }
 0x1df   : >> { %p1920_p8 = scmp.ne.s32.totalorder %s540_s11, %s1919_s1  ;;  %p1927_p0 = scmp.lt.s32.totalorder %s2555_s15, %s1919_s1 }
 0x1e1   : >> { %p1921_p9 = pnand %p1920_p8, %p1495_p13  ;;  %p1928_p11 = por %p1927_p0, %p1926_p7 }
 0x1e3   : >> { %p1922_p12 = pneg %p1921_p9 }
 0x1e5   : >> { %p1929_p1 = pnand %p1928_p11, %p1922_p12 }
 0x1e7   : >> { %1932 = shalt.err (!%p1929_p1)  }
 0x1e8   : >> { %1446 = dma.hbm_to_vmem [thread:$0]  (%p1495_p13), %s529_s23, 16, %s540_s11, %s2535_s30 }
 0x1e9   : >> { %546 = sbr.rel (%p1495_p13) target bundleno = 496 (0x1f0), region = 194 }
 0x1ee   : >> { %v2212_v10 = vmov 0.0  }
 0x1ef   : >> { %1330 = vst [vmem:[%s2524_s3 + $0x2] sm:$0x1] %v2212_v10 }
 0x1f0 PF: >> { %s550_s12 = sadd.s32 3, %s2515_s25  ;;  %s1093_s24 = scalar_lea.vmem %s2524_s3, 3 [#allocation2] }
 0x1f1   : >> { %s551_s18 = sadd.s32 %s2504_s20, %s550_s12  ;;  %s569_s29 = sshll.u32 %s1093_s24, 4  ;;  %s570_s29 = int_to_ptr.vmem [resolvable:$true] %s569_s29 }
 0x1f2   : >> { %s552_s21 = sld [smem:[#allocation6 + %s551_s18]] }
 0x1f3   : >> { %s2890_s6 = sld [smem:[#allocation64_spill]] }
 0x1f8   : >> { %p1496_p10 = scmp.ne.s32.totalorder %s552_s21, 1  ;;  %s1332_s22 = sshll.u32 %s552_s21, 4 }
 0x1f9   : >> { %s559_s13 = scalar_lea.hbm %s2890_s6, %s1332_s22 }
 0x1fa   : >> { %s1933_s23 = scalar_lea.hbm %s559_s13, 16  ;;  %p1938_p4 = scmp.lt.s32.totalorder %s559_s13, %s2890_s6 }
 0x1fb   : >> { %p1934_p13 = scmp.ne.s32.totalorder %s559_s13, %s1933_s23  ;;  %p1939_p5 = scmp.lt.s32.totalorder %s2542_s27, %s1933_s23 }
 0x1fd   : >> { %p1935_p3 = pnand %p1934_p13, %p1496_p10  ;;  %p1940_p6 = por %p1939_p5, %p1938_p4 }
 0x1ff   : >> { %p1936_p2 = pneg %p1935_p3 }
 0x201   : >> { %p1941_p8 = pnand %p1940_p6, %p1936_p2 }
 0x203   : >> { %1944 = shalt.err (!%p1941_p8)  }
 0x204   : >> { %s1945_s12 = scalar_lea.vmem %s570_s29, 16  ;;  %p1952_p0 = scmp.lt.s32.totalorder %s570_s29, %s2552_s19 }
 0x205   : >> { %p1946_p9 = scmp.ne.s32.totalorder %s570_s29, %s1945_s12  ;;  %p1953_p11 = scmp.lt.s32.totalorder %s2555_s15, %s1945_s12 }
 0x207   : >> { %p1947_p12 = pnand %p1946_p9, %p1496_p10  ;;  %p1954_p1 = por %p1953_p11, %p1952_p0 }
 0x209   : >> { %p1948_p7 = pneg %p1947_p12 }
 0x20b   : >> { %p1955_p13 = pnand %p1954_p1, %p1948_p7 }
 0x20d   : >> { %1958 = shalt.err (!%p1955_p13)  }
 0x20e   : >> { %1448 = dma.hbm_to_vmem [thread:$0]  (%p1496_p10), %s559_s13, 16, %s570_s29, %s2535_s30 }
 0x20f   : >> { %576 = sbr.rel (%p1496_p10) target bundleno = 534 (0x216), region = 206 }
 0x214   : >> { %v2213_v11 = vmov 0.0  }
 0x215   : >> { %1338 = vst [vmem:[%s2524_s3 + $0x3] sm:$0x1] %v2213_v11 }
 0x216 PF: >> { %s580_s18 = sadd.s32 4, %s2515_s25  ;;  %s1106_s22 = scalar_lea.vmem %s2524_s3, 4 [#allocation2] }
 0x217   : >> { %s581_s24 = sadd.s32 %s2504_s20, %s580_s18  ;;  %s599_s11 = sshll.u32 %s1106_s22, 4  ;;  %s600_s11 = int_to_ptr.vmem [resolvable:$true] %s599_s11 }
 0x218   : >> { %s582_s14 = sld [smem:[#allocation6 + %s581_s24]] }
 0x219   : >> { %s2891_s6 = sld [smem:[#allocation64_spill]] }
 0x21e   : >> { %p1497_p3 = scmp.ne.s32.totalorder %s582_s14, 1  ;;  %s1340_s23 = sshll.u32 %s582_s14, 4 }
 0x21f   : >> { %s589_s21 = scalar_lea.hbm %s2891_s6, %s1340_s23 }
 0x220   : >> { %s1959_s13 = scalar_lea.hbm %s589_s21, 16  ;;  %p1964_p5 = scmp.lt.s32.totalorder %s589_s21, %s2891_s6 }
 0x221   : >> { %p1960_p10 = scmp.ne.s32.totalorder %s589_s21, %s1959_s13  ;;  %p1965_p6 = scmp.lt.s32.totalorder %s2542_s27, %s1959_s13 }
 0x223   : >> { %p1961_p2 = pnand %p1960_p10, %p1497_p3  ;;  %p1966_p8 = por %p1965_p6, %p1964_p5 }
 0x225   : >> { %p1962_p4 = pneg %p1961_p2 }
 0x227   : >> { %p1967_p9 = pnand %p1966_p8, %p1962_p4 }
 0x229   : >> { %1970 = shalt.err (!%p1967_p9)  }
 0x22a   : >> { %s1971_s18 = scalar_lea.vmem %s600_s11, 16  ;;  %p1978_p11 = scmp.lt.s32.totalorder %s600_s11, %s2552_s19 }
 0x22b   : >> { %p1972_p12 = scmp.ne.s32.totalorder %s600_s11, %s1971_s18  ;;  %p1979_p1 = scmp.lt.s32.totalorder %s2555_s15, %s1971_s18 }
 0x22d   : >> { %p1973_p7 = pnand %p1972_p12, %p1497_p3  ;;  %p1980_p13 = por %p1979_p1, %p1978_p11 }
 0x22f   : >> { %p1974_p0 = pneg %p1973_p7 }
 0x231   : >> { %p1981_p10 = pnand %p1980_p13, %p1974_p0 }
 0x233   : >> { %1984 = shalt.err (!%p1981_p10)  }
 0x234   : >> { %1450 = dma.hbm_to_vmem [thread:$0]  (%p1497_p3), %s589_s21, 16, %s600_s11, %s2535_s30 }
 0x235   : >> { %606 = sbr.rel (%p1497_p3) target bundleno = 572 (0x23c), region = 218 }
 0x23a   : >> { %v2214_v12 = vmov 0.0  }
 0x23b   : >> { %1346 = vst [vmem:[%s2524_s3 + $0x4] sm:$0x1] %v2214_v12 }
 0x23c PF: >> { %s610_s24 = sadd.s32 5, %s2515_s25  ;;  %s1119_s23 = scalar_lea.vmem %s2524_s3, 5 [#allocation2] }
 0x23d   : >> { %s611_s22 = sadd.s32 %s2504_s20, %s610_s24  ;;  %s629_s29 = sshll.u32 %s1119_s23, 4  ;;  %s630_s29 = int_to_ptr.vmem [resolvable:$true] %s629_s29 }
 0x23e   : >> { %s612_s28 = sld [smem:[#allocation6 + %s611_s22]] }
 0x23f   : >> { %s2892_s6 = sld [smem:[#allocation64_spill]] }
 0x244   : >> { %p1498_p2 = scmp.ne.s32.totalorder %s612_s28, 1  ;;  %s1348_s13 = sshll.u32 %s612_s28, 4 }
 0x245   : >> { %s619_s14 = scalar_lea.hbm %s2892_s6, %s1348_s13 }
 0x246   : >> { %s1985_s21 = scalar_lea.hbm %s619_s14, 16  ;;  %p1990_p6 = scmp.lt.s32.totalorder %s619_s14, %s2892_s6 }
 0x247   : >> { %p1986_p3 = scmp.ne.s32.totalorder %s619_s14, %s1985_s21  ;;  %p1991_p8 = scmp.lt.s32.totalorder %s2542_s27, %s1985_s21 }
 0x249   : >> { %p1987_p4 = pnand %p1986_p3, %p1498_p2  ;;  %p1992_p9 = por %p1991_p8, %p1990_p6 }
 0x24b   : >> { %p1988_p5 = pneg %p1987_p4 }
 0x24d   : >> { %p1993_p12 = pnand %p1992_p9, %p1988_p5 }
 0x24f   : >> { %1996 = shalt.err (!%p1993_p12)  }
 0x250   : >> { %s1997_s24 = scalar_lea.vmem %s630_s29, 16  ;;  %p2004_p1 = scmp.lt.s32.totalorder %s630_s29, %s2552_s19 }
 0x251   : >> { %p1998_p7 = scmp.ne.s32.totalorder %s630_s29, %s1997_s24  ;;  %p2005_p13 = scmp.lt.s32.totalorder %s2555_s15, %s1997_s24 }
 0x253   : >> { %p1999_p0 = pnand %p1998_p7, %p1498_p2  ;;  %p2006_p10 = por %p2005_p13, %p2004_p1 }
 0x255   : >> { %p2000_p11 = pneg %p1999_p0 }
 0x257   : >> { %p2007_p3 = pnand %p2006_p10, %p2000_p11 }
 0x259   : >> { %2010 = shalt.err (!%p2007_p3)  }
 0x25a   : >> { %1452 = dma.hbm_to_vmem [thread:$0]  (%p1498_p2), %s619_s14, 16, %s630_s29, %s2535_s30 }
 0x25b   : >> { %636 = sbr.rel (%p1498_p2) target bundleno = 610 (0x262), region = 230 }
 0x260   : >> { %v2215_v13 = vmov 0.0  }
 0x261   : >> { %1354 = vst [vmem:[%s2524_s3 + $0x5] sm:$0x1] %v2215_v13 }
 0x262 PF: >> { %s640_s22 = sadd.s32 6, %s2515_s25  ;;  %s1132_s13 = scalar_lea.vmem %s2524_s3, 6 [#allocation2] }
 0x263   : >> { %s641_s23 = sadd.s32 %s2504_s20, %s640_s22  ;;  %s659_s11 = sshll.u32 %s1132_s13, 4  ;;  %s660_s11 = int_to_ptr.vmem [resolvable:$true] %s659_s11 }
 0x264   : >> { %s642_s1 = sld [smem:[#allocation6 + %s641_s23]] }
 0x265   : >> { %s2893_s6 = sld [smem:[#allocation64_spill]] }
 0x26a   : >> { %p1499_p4 = scmp.ne.s32.totalorder %s642_s1, 1  ;;  %s1356_s21 = sshll.u32 %s642_s1, 4 }
 0x26b   : >> { %s649_s28 = scalar_lea.hbm %s2893_s6, %s1356_s21 }
 0x26c   : >> { %s2011_s14 = scalar_lea.hbm %s649_s28, 16  ;;  %p2016_p8 = scmp.lt.s32.totalorder %s649_s28, %s2893_s6 }
 0x26d   : >> { %p2012_p2 = scmp.ne.s32.totalorder %s649_s28, %s2011_s14  ;;  %p2017_p9 = scmp.lt.s32.totalorder %s2542_s27, %s2011_s14 }
 0x26f   : >> { %p2013_p5 = pnand %p2012_p2, %p1499_p4  ;;  %p2018_p12 = por %p2017_p9, %p2016_p8 }
 0x271   : >> { %p2014_p6 = pneg %p2013_p5 }
 0x273   : >> { %p2019_p7 = pnand %p2018_p12, %p2014_p6 }
 0x275   : >> { %2022 = shalt.err (!%p2019_p7)  }
 0x276   : >> { %s2023_s22 = scalar_lea.vmem %s660_s11, 16  ;;  %p2030_p13 = scmp.lt.s32.totalorder %s660_s11, %s2552_s19 }
 0x277   : >> { %p2024_p0 = scmp.ne.s32.totalorder %s660_s11, %s2023_s22  ;;  %p2031_p10 = scmp.lt.s32.totalorder %s2555_s15, %s2023_s22 }
 0x279   : >> { %p2025_p11 = pnand %p2024_p0, %p1499_p4  ;;  %p2032_p3 = por %p2031_p10, %p2030_p13 }
 0x27b   : >> { %p2026_p1 = pneg %p2025_p11 }
 0x27d   : >> { %p2033_p2 = pnand %p2032_p3, %p2026_p1 }
 0x27f   : >> { %2036 = shalt.err (!%p2033_p2)  }
 0x280   : >> { %1454 = dma.hbm_to_vmem [thread:$0]  (%p1499_p4), %s649_s28, 16, %s660_s11, %s2535_s30 }
 0x281   : >> { %666 = sbr.rel (%p1499_p4) target bundleno = 648 (0x288), region = 242 }
 0x286   : >> { %v2216_v14 = vmov 0.0  }
 0x287   : >> { %1362 = vst [vmem:[%s2524_s3 + $0x6] sm:$0x1] %v2216_v14 }
 0x288 PF: >> { %s670_s23 = sadd.s32 7, %s2515_s25  ;;  %s1145_s21 = scalar_lea.vmem %s2524_s3, 7 [#allocation2] }
 0x289   : >> { %s671_s13 = sadd.s32 %s2504_s20, %s670_s23  ;;  %s689_s29 = sshll.u32 %s1145_s21, 4  ;;  %s690_s29 = int_to_ptr.vmem [resolvable:$true] %s689_s29 }
 0x28a   : >> { %s672_s12 = sld [smem:[#allocation6 + %s671_s13]] }
 0x28b   : >> { %s2894_s6 = sld [smem:[#allocation64_spill]] }
 0x290   : >> { %p1500_p5 = scmp.ne.s32.totalorder %s672_s12, 1  ;;  %s1364_s14 = sshll.u32 %s672_s12, 4 }
 0x291   : >> { %s679_s1 = scalar_lea.hbm %s2894_s6, %s1364_s14 }
 0x292   : >> { %s2037_s28 = scalar_lea.hbm %s679_s1, 16  ;;  %p2042_p9 = scmp.lt.s32.totalorder %s679_s1, %s2894_s6 }
 0x293   : >> { %p2038_p4 = scmp.ne.s32.totalorder %s679_s1, %s2037_s28  ;;  %p2043_p12 = scmp.lt.s32.totalorder %s2542_s27, %s2037_s28 }
 0x295   : >> { %p2039_p6 = pnand %p2038_p4, %p1500_p5  ;;  %p2044_p7 = por %p2043_p12, %p2042_p9 }
 0x297   : >> { %p2040_p8 = pneg %p2039_p6 }
 0x299   : >> { %p2045_p0 = pnand %p2044_p7, %p2040_p8 }
 0x29b   : >> { %2048 = shalt.err (!%p2045_p0)  }
 0x29c   : >> { %s2049_s25 = scalar_lea.vmem %s690_s29, 16  ;;  %p2056_p10 = scmp.lt.s32.totalorder %s690_s29, %s2552_s19 }
 0x29d   : >> { %p2050_p11 = scmp.ne.s32.totalorder %s690_s29, %s2049_s25  ;;  %p2057_p3 = scmp.lt.s32.totalorder %s2555_s15, %s2049_s25 }
 0x29f   : >> { %p2051_p1 = pnand %p2050_p11, %p1500_p5  ;;  %p2058_p2 = por %p2057_p3, %p2056_p10 }
 0x2a1   : >> { %p2052_p13 = pneg %p2051_p1 }
 0x2a3   : >> { %p2059_p4 = pnand %p2058_p2, %p2052_p13 }
 0x2a5   : >> { %2062 = shalt.err (!%p2059_p4)  }
 0x2a6   : >> { %1456 = dma.hbm_to_vmem [thread:$0]  (%p1500_p5), %s679_s1, 16, %s690_s29, %s2535_s30 }
 0x2a7   : >> { %696 = sbr.rel (%p1500_p5) target bundleno = 686 (0x2ae), region = 254 }
 0x2ac   : >> { %v2217_v15 = vmov 0.0  }
 0x2ad   : >> { %1370 = vst [vmem:[%s2524_s3 + $0x7] sm:$0x1] %v2217_v15 }
 0x2ae PF: >> { %s459_s2 = sadd.s32 1, %s2185_s2  }
 0x2af   : >> { %p456_p6 = scmp.ge.s32.totalorder %s459_s2, 2  }
 0x2b1   : > { %458 = sbr.rel (!%p456_p6) target bundleno = 381 (0x17d), region = 429 }
 0x2b6 PF: > { %p700_p8 = scmp.lt.s32.totalorder %s2288_s10, 0  ;;  %s701_s27 = ssub.s32 0, %s2288_s10 }
 0x2b7   : > { %s1371_s30 = smin.u32 %s2288_s10, %s701_s27  ;;  %s2700_s19 = sshll.u32 %s2288_s10, 4 }
 0x2b8   : > { %s703_s15 = sand.u32 1, %s1371_s30   ;;  %s2704_s13 = smov 0  }
 0x2b9   : > { %s704_s23 = ssub.s32 0, %s703_s15 }
 0x2ba   : > { %s2912_s23 = smov (!%p700_p8, %s704_s23), %s703_s15 }
 0x2bb   : > { %p1373_p5 = scmp.lt.s32.totalorder %s2912_s23, 0  ;;  %s710_s3 = sadd.s32 2, %s2912_s23 }
 0x2bd   : > { %s2914_s3 = smov (!%p1373_p5, %s710_s3), %s2912_s23 }
 0x2be LB: >> { %s2710_s20 = sshll.u32 %s2189_s13, 3  ;;  %s718_s13 = sadd.s32 1, %s2189_s13   ;;  %s2189_s13 = sphi %s2704_s13, %s718_s13  }
 0x2bf   : >> { %s720_s2 = sadd.s32 %s2710_s20, %s2700_s19  ;;  %s726_s12 = sadd.s32 1, %s2710_s20 }
 0x2c0   : >> { %s721_s21 = sld [smem:[#allocation7 + %s720_s2]]  ;;  %s727_s29 = sadd.s32 %s2700_s19, %s726_s12 }
 0x2c1   : >> { %s733_s14 = sadd.s32 2, %s2710_s20  ;;  %s728_s18 = sld [smem:[#allocation7 + %s727_s29]] }
 0x2c2   : >> { %s734_s11 = sadd.s32 %s2700_s19, %s733_s14  ;;  %s740_s28 = sadd.s32 3, %s2710_s20 }
 0x2c3   : >> { %s735_s1 = sld [smem:[#allocation7 + %s734_s11]]  ;;  %s741_s24 = sadd.s32 %s2700_s19, %s740_s28 }
 0x2c4   : >> { %s747_s22 = sadd.s32 4, %s2710_s20  ;;  %s742_s25 = sld [smem:[#allocation7 + %s741_s24]] }
 0x2c5   : >> { %s748_s27 = sadd.s32 %s2700_s19, %s747_s22  ;;  %s754_s23 = sadd.s32 5, %s2710_s20 }
 0x2c6   : >> { %s749_s30 = sld [smem:[#allocation7 + %s748_s27]]  ;;  %s722_s15 = scalar_lea.vmem [#allocation8], %s721_s21 }
 0x2c7   : >> { %v723_v16 = vld [vmem:[%s722_s15] sm:$0x1]  ;;  %s761_s2 = sadd.s32 6, %s2710_s20  ;;  %s724_s6 = scalar_lea.vmem [#allocation3], %s2710_s20 }
 0x2c8   : >> { %725 = vst [vmem:[%s724_s6] sm:$0x1] %v723_v16  ;;  %s755_s12 = sadd.s32 %s2700_s19, %s754_s23  ;;  %s729_s17 = scalar_lea.vmem [#allocation8], %s728_s18 }
 0x2c9   : >> { %v730_v17 = vld [vmem:[%s729_s17] sm:$0x1]  ;;  %s756_s29 = sld [smem:[#allocation7 + %s755_s12]]  ;;  %s736_s14 = scalar_lea.vmem [#allocation8], %s735_s1 }
 0x2ca   : >> { %1377 = vst [vmem:[%s724_s6 + $0x1] sm:$0x1] %v730_v17  ;;  %v737_v18 = vld [vmem:[%s736_s14] sm:$0x1]  ;;  %s762_s11 = sadd.s32 %s2700_s19, %s761_s2  ;;  %s768_s28 = sadd.s32 7, %s2710_s20 }
 0x2cb   : >> { %1379 = vst [vmem:[%s724_s6 + $0x2] sm:$0x1] %v737_v18  ;;  %s763_s24 = sld [smem:[#allocation7 + %s762_s11]]  ;;  %s743_s22 = scalar_lea.vmem [#allocation8], %s742_s25 }
 0x2cc   : >> { %v744_v19 = vld [vmem:[%s743_s22] sm:$0x1]  ;;  %s769_s21 = sadd.s32 %s2700_s19, %s768_s28  ;;  %s750_s27 = scalar_lea.vmem [#allocation8], %s749_s30 }
 0x2cd   : >> { %1381 = vst [vmem:[%s724_s6 + $0x3] sm:$0x1] %v744_v19  ;;  %v751_v20 = vld [vmem:[%s750_s27] sm:$0x1]  ;;  %s770_s15 = sld [smem:[#allocation7 + %s769_s21]]  ;;  %p715_p9 = scmp.ge.s32.totalorder %s718_s13, 2  }
 0x2ce   : >> { %1383 = vst [vmem:[%s724_s6 + $0x4] sm:$0x1] %v751_v20  ;;  %s1390_s20 = sshll.u32 (%p715_p9), %s2914_s3, 4 }
 0x2cf   : >> { %s757_s0 = scalar_lea.vmem [#allocation8], %s756_s29 }
 0x2d0   : >> { %v758_v21 = vld [vmem:[%s757_s0] sm:$0x1]  ;;  %s2737_s0 = smov (%p715_p9), 0  }
 0x2d1   : >> { %1385 = vst [vmem:[%s724_s6 + $0x5] sm:$0x1] %v758_v21  ;;  %s764_s17 = scalar_lea.vmem [#allocation8], %s763_s24  ;;  %717 = sbr.rel (!%p715_p9) target bundleno = 702 (0x2be), region = 440 }
 0x2d2   : >> { %v765_v22 = vld [vmem:[%s764_s17] sm:$0x1] }
 0x2d3   : >> { %1387 = vst [vmem:[%s724_s6 + $0x6] sm:$0x1] %v765_v22  ;;  %s771_s18 = scalar_lea.vmem [#allocation8], %s770_s15 }
 0x2d4   : >> { %v772_v23 = vld [vmem:[%s771_s18] sm:$0x1] }
 0x2d5   : >> { %1389 = vst [vmem:[%s724_s6 + $0x7] sm:$0x1] %v772_v23 }
 0x2dc   : > { %v2732_v24 = vld [vmem:[#allocation3] sm:$0xff]  ;;  %v2734_v25 = vld [vmem:[#allocation3 + $0x8] sm:$0xff] }
 0x2dd LB: >> { %s2743_s6 = sshll.u32 %s2193_s0, 3  ;;  %s2748_s25 = scalar_lea.sflag [#allocation4], %s2914_s3  ;;  %s2193_s0 = sphi %s2737_s0, %s783_s0  }
 0x2de   : >> { %s785_s13 = sadd.s32 %s2743_s6, %s2700_s19 }
 0x2df   : >> { %s786_s1 = sld [smem:[#allocation6 + %s785_s13]] }
 0x2e5   : >> { %p1501_p12 = scmp.ne.s32.totalorder %s786_s1, 1 }
 0x2e7   : >> { %2128 = dma.done.wait (%p1501_p12), %s2748_s25, 16 }
 0x2e8   : >> { %2130 = vsyncadd (%p1501_p12), %s2748_s25, 4294967280  ;;  %s795_s30 = sadd.s32 1, %s2743_s6 }
 0x2e9   : >> { %s796_s23 = sadd.s32 %s2700_s19, %s795_s30 }
 0x2ea   : >> { %s797_s2 = sld [smem:[#allocation6 + %s796_s23]] }
 0x2f0   : >> { %p1502_p7 = scmp.ne.s32.totalorder %s797_s2, 1 }
 0x2f2   : >> { %2132 = dma.done.wait (%p1502_p7), %s2748_s25, 16 }
 0x2f3   : >> { %2134 = vsyncadd (%p1502_p7), %s2748_s25, 4294967280  ;;  %s806_s12 = sadd.s32 2, %s2743_s6 }
 0x2f4   : >> { %s807_s29 = sadd.s32 %s2700_s19, %s806_s12 }
 0x2f5   : >> { %s808_s14 = sld [smem:[#allocation6 + %s807_s29]] }
 0x2fb   : >> { %p1503_p0 = scmp.ne.s32.totalorder %s808_s14, 1 }
 0x2fd   : >> { %2136 = dma.done.wait (%p1503_p0), %s2748_s25, 16 }
 0x2fe   : >> { %2138 = vsyncadd (%p1503_p0), %s2748_s25, 4294967280  ;;  %s817_s11 = sadd.s32 3, %s2743_s6 }
 0x2ff   : >> { %s818_s28 = sadd.s32 %s2700_s19, %s817_s11 }
 0x300   : >> { %s819_s24 = sld [smem:[#allocation6 + %s818_s28]] }
 0x306   : >> { %p1504_p11 = scmp.ne.s32.totalorder %s819_s24, 1 }
 0x308   : >> { %2140 = dma.done.wait (%p1504_p11), %s2748_s25, 16 }
 0x309   : >> { %2142 = vsyncadd (%p1504_p11), %s2748_s25, 4294967280  ;;  %s828_s22 = sadd.s32 4, %s2743_s6 }
 0x30a   : >> { %s829_s21 = sadd.s32 %s2700_s19, %s828_s22 }
 0x30b   : >> { %s830_s27 = sld [smem:[#allocation6 + %s829_s21]] }
 0x311   : >> { %p1505_p1 = scmp.ne.s32.totalorder %s830_s27, 1 }
 0x313   : >> { %2144 = dma.done.wait (%p1505_p1), %s2748_s25, 16 }
 0x314   : >> { %2146 = vsyncadd (%p1505_p1), %s2748_s25, 4294967280  ;;  %s839_s15 = sadd.s32 5, %s2743_s6 }
 0x315   : >> { %s840_s17 = sadd.s32 %s2700_s19, %s839_s15 }
 0x316   : >> { %s841_s18 = sld [smem:[#allocation6 + %s840_s17]] }
 0x31c   : >> { %p1506_p13 = scmp.ne.s32.totalorder %s841_s18, 1 }
 0x31e   : >> { %2148 = dma.done.wait (%p1506_p13), %s2748_s25, 16 }
 0x31f   : >> { %2150 = vsyncadd (%p1506_p13), %s2748_s25, 4294967280  ;;  %s850_s13 = sadd.s32 6, %s2743_s6 }
 0x320   : >> { %s851_s1 = sadd.s32 %s2700_s19, %s850_s13 }
 0x321   : >> { %s852_s30 = sld [smem:[#allocation6 + %s851_s1]] }
 0x327   : >> { %p1507_p10 = scmp.ne.s32.totalorder %s852_s30, 1 }
 0x329   : >> { %2152 = dma.done.wait (%p1507_p10), %s2748_s25, 16 }
 0x32a   : >> { %2154 = vsyncadd (%p1507_p10), %s2748_s25, 4294967280  ;;  %s861_s23 = sadd.s32 7, %s2743_s6 }
 0x32b   : >> { %s862_s2 = sadd.s32 %s2700_s19, %s861_s23 }
 0x32c   : >> { %s863_s12 = sld [smem:[#allocation6 + %s862_s2]] }
 0x332   : >> { %p1508_p3 = scmp.ne.s32.totalorder %s863_s12, 1 }
 0x334   : >> { %2156 = dma.done.wait (%p1508_p3), %s2748_s25, 16 }
 0x335   : >> { %2158 = vsyncadd (%p1508_p3), %s2748_s25, 4294967280  ;;  %s783_s0 = sadd.s32 1, %s2193_s0  }
 0x336   : >> { %p780_p2 = scmp.ge.s32.totalorder %s783_s0, 2  }
 0x337   : > { %s872_s29 = scalar_lea.vmem (%p780_p2), [#allocation2], %s1390_s20  ;;  %v1400_v46 = vld [vmem:[%s2850_s4] ss:$0 sm:$0xff] (%p780_p2)  ;;  %s1415_s6 = sshll.u32 (%p780_p2), %s2288_s10, 7 }
 0x338   : > { %782 = sbr.rel (!%p780_p2) target bundleno = 733 (0x2dd), region = 451  ;;  %v873_v26 = vld [vmem:[%s872_s29] sm:$0xff] (%p780_p2)  ;;  %v874_v27 = vld [vmem:[%s872_s29 + $0x8] sm:$0xff] (%p780_p2)  ;;  %s2895_s25 = scalar_lea.vmem (%p780_p2), [#allocation11], %s2337_s26 }
 0x339   : > { %v875_v28 = vadd.f32 (%p780_p2), %v873_v26, %v2732_v24  ;;  %v876_v29 = vadd.f32 (%p780_p2), %v874_v27, %v2734_v25  ;;  %v1401_v50 = vld [vmem:[%s2851_s5] ss:$0 sm:$0xff] (%p780_p2)  ;;  %s942_s14 = sshll.u32 (%p780_p2), %s2895_s25, 4  ;;  %s2799_s24 = scalar_lea.hbm (%p780_p2), %s2853_s7, %s1415_s6  ;;  %s2801_s14 = int_to_ptr.vmem [resolvable:$true] %s942_s14 }
 0x33a   : > { %s2896_s22 = smov (%p780_p2), %s2895_s25  ;;  %s2897_s21 = sand.u32 (%p780_p2), 1, %s2169_s8  }
 0x33b   : > { %877 = vadd.xlane.f32.xlu0 (%p780_p2), %v875_v28  ;;  %s2807_s27 = scalar_lea.sflag (%p780_p2), [#allocation10], %s2897_s21  ;;  %s2063_s10 = scalar_lea.vmem (%p780_p2), %s2801_s14, 128 }
 0x33c   : > { %p2064_p4 = scmp.ne.s32.totalorder (%p780_p2), %s2801_s14, %s2063_s10  ;;  %p2898_p6 = scmp.ne.s32.totalorder (%p780_p2), %s2870_s16, 0 }
 0x33d   : > { %s2218_s15 = smov [#allocation11]  }
 0x33e   : > { %p2065_p8 = pnand %p2064_p4, %p2898_p6  ;;  %s2067_s17 = sshll.u32 %s2218_s15, 4  ;;  %s2068_s17 = int_to_ptr.vmem [resolvable:$false] %s2067_s17 }
 0x33f   : > { %879 = vadd.xlane.f32.xlu0 %v876_v29  ;;  %s2069_s18 = scalar_lea.vmem %s2068_s17, 256  ;;  %p2070_p9 = scmp.lt.s32.totalorder %s2801_s14, %s2068_s17 }
 0x340   : > { %p2066_p5 = pneg %p2065_p8  ;;  %p2071_p12 = scmp.lt.s32.totalorder %s2069_s18, %s2063_s10 }
 0x342   : > { %p2072_p7 = por %p2071_p12, %p2070_p9 }
 0x344   : > { %p2073_p0 = pnand %p2072_p7, %p2066_p5 }
 0x3c4   : > { %v878_v30 = vpop.xlane.xlu0 %877 }
 0x3c5   : > { %v882_v31 = vmul.f32 0.0078125, %v878_v30 }
 0x3c7   : > { %v884_v32 = vsub.f32 %v875_v28, %v882_v31 }
 0x3c8   : > { %v880_v33 = vpop.xlane.xlu0 %879 }
 0x3c9   : > { %v883_v34 = vmul.f32 0.0078125, %v880_v33  ;;  %v886_v35 = vmul.f32 %v884_v32, %v884_v32 }
 0x3cb   : > { %v885_v36 = vsub.f32 %v876_v29, %v883_v34  ;;  %888 = vadd.xlane.f32.xlu1 %v886_v35 }
 0x3cd   : > { %v887_v37 = vmul.f32 %v885_v36, %v885_v36 }
 0x3cf   : > { %890 = vadd.xlane.f32.xlu1 %v887_v37 }
 0x454   : > { %v889_v38 = vpop.xlane.xlu1 %888 }
 0x455   : > { %v892_v39 = vmul.f32 0.0078125, %v889_v38 }
 0x457   : > { %v894_v40 = vadd.f32 1e-05, %v892_v39 }
 0x458   : > { %v891_v41 = vpop.xlane.xlu1 %890 }
 0x459   : > { %1597 = vrsqrt.f32 %v894_v40  ;;  %v893_v42 = vmul.f32 0.0078125, %v891_v41 }
 0x45b   : > { %v895_v43 = vadd.f32 1e-05, %v893_v42 }
 0x45d   : > { %1599 = vrsqrt.f32 %v895_v43 }
 0x466   : > { %v1598_v44 = vpop.eup %1597 }
 0x467   : > { %v898_v45 = vmul.f32 %v1598_v44, %v884_v32 }
 0x469   : > { %v907_v49 = vmul.f32 %v1400_v46, %v898_v45 }
 0x46a   : > { %v1600_v47 = vpop.eup %1599 }
 0x46b   : > { %v899_v48 = vmul.f32 %v1600_v47, %v885_v36  ;;  %v916_v52 = vadd.f32 %v1401_v50, %v907_v49 }
 0x46d   : > { %v908_v51 = vmul.f32 %v1400_v46, %v899_v48 }
 0x46f   : > { %v917_v53 = vadd.f32 %v1401_v50, %v908_v51 }
 0x471   : > { %v1419_v54 = vpack.c.bf16 %v917_v53, %v916_v52 }
 0x473   : > { %1420 = vst [vmem:[%s2896_s22] sm:$0xff] %v1419_v54  }
 0x474   : > { %2076 = shalt.err (!%p2073_p0)
}
 0x475   : > { %s2077_s26 = scalar_lea.hbm %s2799_s24, 128  ;;  %s2081_s30 = scalar_lea.hbm %s2853_s7, 256 }
 0x476   : > { %p2078_p11 = scmp.ne.s32.totalorder %s2799_s24, %s2077_s26  ;;  %p2082_p10 = scmp.lt.s32.totalorder %s2799_s24, %s2853_s7 }
 0x477   : > { %p2083_p3 = scmp.lt.s32.totalorder %s2081_s30, %s2077_s26 }
 0x478   : > { %p2079_p1 = pnand %p2078_p11, %p2898_p6 }
 0x479   : > { %p2084_p2 = por %p2083_p3, %p2082_p10 }
 0x47a   : > { %p2080_p13 = pneg %p2079_p1 }
 0x47c   : > { %p2085_p4 = pnand %p2084_p2, %p2080_p13 }
 0x47e   : > { %2088 = shalt.err (!%p2085_p4)
}
 0x47f   : > { %s2219_s12 = smov 64   ;;  %s2220_s29 = smov 4  }
 0x480   : > { %1473 = dma.vmem_to_hbm [thread:$0]  (%p2898_p6), %s2801_s14, 128, %s2799_s24, %s2807_s27, %s2219_s12, %s2219_s12, %s2220_s29  }
 0x481 PF: > { %s2899_s19 = sld [smem:[#allocation57_spill]]  ;;  %p1509_p8 = scmp.ge.s32.totalorder %s2177_s9, 2 }
 0x482   : > { %s2900_s3 = sld [smem:[#allocation61_spill]] }
 0x487   : > { %s957_s20 = sand.u32 1, %s2899_s19  }
 0x488   : > { %p2901_p5 = scmp.ne.s32.totalorder %s2900_s3, 0  ;;  %s958_s0 = scalar_lea.sflag [#allocation10], %s957_s20 }
 0x48a   : > { %p1480_p9 = pnand %p1509_p8, %p2901_p5 }
 0x48c   : > { %p1481_p12 = pneg %p1480_p9 }
 0x48e   : > { %2160 = dma.done.wait (%p1481_p12), %s958_s0, 128  }
 0x48f   : > { %2162 = vsyncadd (%p1481_p12), %s958_s0, 4294967168  ;;  %s2902_s9 = sld [smem:[#allocation59_spill]]  ;;  %s2905_s0 = smov %s2169_s8 }
 0x490   : > { %s2903_s6 = sld [smem:[#allocation58_spill]] }
 0x491   : > { %s2904_s1 = sld [smem:[#allocation60_spill]] }
 0x495   : > { %p26_p7 = scmp.ge.s32.totalorder %s2902_s9, 4  }
 0x496   : > { %s2906_s8 = smov %s2903_s6 }
 0x497   :  { %28 = sbr.rel (!%p26_p7) target bundleno = 21 (0x15), region = 462 }
 0x49c   :  { %963 = vsyncpa [#allocation9], 1 }
 0x49d   :  { %965 = vsyncpa [#allocation9 + $0x1], 1 }
 0x49e   :  { %966 = vsyncpa [#allocation10], 1 }
 0x49f   :  { %968 = vsyncpa [#allocation10 + $0x1], 1 }
 0x4a0   :  { %969 = vsyncmov [#allocation4] }
 0x4a3   :  { %s970_s16 = vpop.sfrf %969 }
 0x4a4   :  { %p1409_p6 = scmp.ne.s32.totalorder %s970_s16, 0 }
 0x4a6   :  { %974 = shalt.err (%p1409_p6)  }
 0x4a7   :  { %976 = vsyncmov [#allocation4 + $0x1] }
 0x4aa   :  { %s977_s25 = vpop.sfrf %976 }
 0x4ab   :  { %p1410_p0 = scmp.ne.s32.totalorder %s977_s25, 0 }
 0x4ad   :  { %981 = shalt.err (%p1410_p0)  }

</bundles_post_ra>
